<compile_context>
chip_gen: v5e
topology: v5e:2x2
jax: 0.10.0
libtpu: 0.0.40
codegen_flags: <defaults>
</compile_context>

<pallas_src>
import functools

import jax
import jax.numpy as jnp
from jax.experimental import pallas as pl
from jax.experimental.pallas import tpu as pltpu

_EPS = 1e-5  # torch.nn.BatchNorm3d default eps


def _round_up(v, m):
    return (v + m - 1) // m * m


# ----------------------------------------------------------------------------
# Pallas kernel: 3x3x3 conv over a zero-padded, channel-major, spatially
# flattened activation block.
#   x_ref  : (1, CP, Q)      Q = (D+2)*(H+2)*(W+2), halo already zero
#   w_ref  : (27, CP, CP)    per-tap (C_out, C_in) weight matrices
#   out_ref: (1, CP, span)   output columns indexed p = d*PH + h*PW + w
# For tap (kd,kh,kw) with flat offset s, output column p reads input column
# s + p = (d+kd)*PH + (h+kh)*PW + (w+kw) -> exactly the shifted padded voxel,
# so valid columns are exact; the few "wrap" columns are junk and are sliced
# away in the wrapper.
# ----------------------------------------------------------------------------
def _conv3d_kernel(x_ref, w_ref, out_ref, *, offsets, span):
    for k, s in enumerate(offsets):
        win = x_ref[0, :, s:s + span]                         # (CP, span)
        contrib = jnp.dot(w_ref[k], win,
                          preferred_element_type=jnp.float32)  # MXU
        if k == 0:
            out_ref[0] = contrib          # init: no zero-fill needed
        else:
            out_ref[0] += contrib         # accumulate in the VMEM output block


def _conv3x3x3_pallas(t_padded, w_packed, D, H, W, CP):
    """t_padded: (N, CP, D+2, H+2, W+2) post-affine+ReLU, zero halo (f32)."""
    N = t_padded.shape[0]
    PW = W + 2
    PH = (H + 2) * PW
    Q = (D + 2) * PH
    span = (D - 1) * PH + (H - 1) * PW + W        # last needed column + 1
    offsets = tuple(kd * PH + kh * PW + kw
                    for kd in range(3) for kh in range(3) for kw in range(3))

    t_flat = t_padded.reshape(N, CP, Q)

    kernel = functools.partial(_conv3d_kernel, offsets=offsets, span=span)
    y_flat = pl.pallas_call(
        kernel,
        out_shape=jax.ShapeDtypeStruct((N, CP, span), jnp.float32),
        grid=(N,),
        in_specs=[
            pl.BlockSpec((1, CP, Q), lambda n: (n, 0, 0)),
            pl.BlockSpec((27, CP, CP), lambda n: (0, 0, 0)),
        ],
        out_specs=pl.BlockSpec((1, CP, span), lambda n: (n, 0, 0)),
        compiler_params=pltpu.CompilerParams(
            dimension_semantics=("parallel",),     # shard batch across TCs
            vmem_limit_bytes=32 * 1024 * 1024,
        ),
    )(t_flat, w_packed)

    # Undo the flattened padded-frame column layout (valid p = d*PH + h*PW + w)
    y = jnp.pad(y_flat, ((0, 0), (0, 0), (0, D * PH - span)))
    y = y.reshape(N, CP, D, H + 2, W + 2)[:, :, :, :H, :W]
    return y                                        # (N, CP, D, H, W)


# ----------------------------------------------------------------------------
# Wrapper: BN stats (one pass), affine+ReLU+pad (XLA, fused), two conv kernels,
# residual add.
# ----------------------------------------------------------------------------
def _bn_scale_shift(x, gamma, beta):
    # Training-mode BatchNorm3d folded into per-channel scale/shift.
    # One-pass stats: var = E[x^2] - E[x]^2 (biased variance, as PyTorch).
    mean = jnp.mean(x, axis=(0, 2, 3, 4))
    mean_sq = jnp.mean(x * x, axis=(0, 2, 3, 4))
    var = mean_sq - mean * mean
    scale = gamma * jax.lax.rsqrt(var + _EPS)
    shift = beta - mean * scale
    return scale, shift


def residual_3d_forward(x, w1, w2, g1, b1, g2, b2):
    """Forward of residual_3d_module. x: (N, C, D, H, W) NCDHW (PyTorch)."""
    N, C, D, H, W = x.shape
    CP = _round_up(C, 8)  # pad channels to sublane granularity for the MXU dot

    def pack_w(w):
        # (C_out, C_in, 3,3,3) -> (27, C_out, C_in), tap k = kd*9 + kh*3 + kw,
        # zero-padded to (27, CP, CP).  One-time, matmul-friendly repack.
        wk = jnp.transpose(w, (2, 3, 4, 0, 1)).reshape(27, C, C)
        return jnp.pad(wk, ((0, 0), (0, CP - C), (0, CP - C))).astype(jnp.float32)

    w1p, w2p = pack_w(w1), pack_w(w2)

    def pre(t, scale, shift):
        # affine + ReLU, then zero-pad channels to CP and spatial dims by 1.
        # Padding after ReLU keeps the conv halo exactly zero.
        a = jnp.maximum(t * scale[None, :, None, None, None]
                        + shift[None, :, None, None, None], 0.0)
        return jnp.pad(a.astype(jnp.float32),
                       ((0, 0), (0, CP - C), (1, 1), (1, 1), (1, 1)))

    s1, c1 = _bn_scale_shift(x, g1, b1)
    y1 = _conv3x3x3_pallas(pre(x, s1, c1), w1p, D, H, W, CP)[:, :C]

    s2, c2 = _bn_scale_shift(y1, g2, b2)
    y2 = _conv3x3x3_pallas(pre(y1, s2, c2), w2p, D, H, W, CP)[:, :C]

    return (y2 + x).astype(x.dtype)   # residual add (fused by XLA with slicing)


# TODO(synk): for volumes where one sample's padded slab exceeds VMEM, add a
# halo-tiled D/H grid axis (BN is already hoisted, so tiling stays correct).


# ----------------------------------------------------------------------------
# Pure-JAX reference (PyTorch training-mode semantics) and self-test.
# ----------------------------------------------------------------------------
def _reference(x, w1, w2, g1, b1, g2, b2):
    def bn_relu(t, g, b):
        mean = jnp.mean(t, axis=(0, 2, 3, 4), keepdims=True)
        var = jnp.mean((t - mean) ** 2, axis=(0, 2, 3, 4), keepdims=True)
        y = (t - mean) * jax.lax.rsqrt(var + _EPS) * g.reshape(1, -1, 1, 1, 1) \
            + b.reshape(1, -1, 1, 1, 1)
        return jnp.maximum(y, 0.0)

    def conv(t, w):
        return jax.lax.conv_general_dilated(
            t, w, window_strides=(1, 1, 1),
            padding=((1, 1), (1, 1), (1, 1)),
            dimension_numbers=("NCDHW", "OIDHW", "NCDHW"))

    out = conv(bn_relu(x, g1, b1), w1)
    out = conv(bn_relu(out, g2, b2), w2)
    return out + x


if __name__ == "__main__":
    key = jax.random.PRNGKey(0)
    k_x, k_w1, k_w2, k_g1, k_b1, k_g2, k_b2 = jax.random.split(key, 7)

    N, C, D, H, W = 2, 4, 4, 8, 8
    x = jax.random.normal(k_x, (N, C, D, H, W), jnp.float32)

    fan_in = C * 3 * 3 * 3
    bound = 1.0 / (fan_in ** 0.5)
    w1 = jax.random.uniform(k_w1, (C, C, 3, 3, 3), jnp.float32, -bound, bound)
    w2 = jax.random.uniform(k_w2, (C, C, 3, 3, 3), jnp.float32, -bound, bound)
    g1 = 1.0 + 0.1 * jax.random.normal(k_g1, (C,), jnp.float32)
    b1 = 0.1 * jax.random.normal(k_b1, (C,), jnp.float32)
    g2 = 1.0 + 0.1 * jax.random.normal(k_g2, (C,), jnp.float32)
    b2 = 0.1 * jax.random.normal(k_b2, (C,), jnp.float32)

    out = jax.jit(residual_3d_forward)(x, w1, w2, g1, b1, g2, b2)
    out = jax.block_until_ready(out)

    ref = _reference(x, w1, w2, g1, b1, g2, b2)
    assert out.shape == ref.shape == (N, C, D, H, W)
    max_err = float(jnp.max(jnp.abs(out - ref)))
    assert jnp.allclose(out, ref, rtol=1e-4, atol=1e-4), max_err
    print("KERNEL_OK")
</pallas_src>

<mosaic_0001>
module attributes {stable_mosaic.version = 11 : i64} {
  func.func @_conv3d_kernel(%arg0: i32, %arg1: memref<1x8x600xf32, #tpu.memory_space<vmem>>, %arg2: memref<27x8x8xf32, #tpu.memory_space<vmem>>, %arg3: memref<1x8x378xf32, #tpu.memory_space<vmem>>) attributes {dimension_semantics = [#tpu.dimension_semantics<parallel>], iteration_bounds = array<i64: 2>, scalar_prefetch = 0 : i64, scratch_operands = 0 : i64, tpu.core_type = #tpu.core_type<tc>, window_params = [{transform_indices = @transform_0, window_bounds = array<i64: 1, 8, 600>}, {pipeline_mode = #tpu.pipeline_mode<synchronous>, transform_indices = @transform_1, window_bounds = array<i64: 27, 8, 8>}, {transform_indices = @transform_2, window_bounds = array<i64: 1, 8, 378>}]} {
    %c0 = arith.constant 0 : index
    %c0_0 = arith.constant 0 : index
    %c0_1 = arith.constant 0 : index
    %0 = vector.load %arg1[%c0, %c0_0, %c0_1] : memref<1x8x600xf32, #tpu.memory_space<vmem>>, vector<1x8x378xf32>
    %1 = vector.shape_cast %0 : vector<1x8x378xf32> to vector<8x378xf32>
    %c0_2 = arith.constant 0 : index
    %c0_3 = arith.constant 0 : index
    %c0_4 = arith.constant 0 : index
    %2 = vector.load %arg2[%c0_2, %c0_3, %c0_4] : memref<27x8x8xf32, #tpu.memory_space<vmem>>, vector<1x8x8xf32>
    %3 = vector.shape_cast %2 : vector<1x8x8xf32> to vector<8x8xf32>
    %cst = arith.constant dense<0.000000e+00> : vector<8x378xf32>
    %4 = tpu.matmul %3, %1, %cst {dimension_numbers = #tpu.dot_dimension_numbers<[1], [0], [0], [1], [0, 0, 1, 1], [], []>} : vector<8x8xf32>, vector<8x378xf32>, vector<8x378xf32> -> vector<8x378xf32>
    %c0_5 = arith.constant 0 : index
    %c0_6 = arith.constant 0 : index
    %c0_7 = arith.constant 0 : index
    %5 = vector.load %arg3[%c0_5, %c0_6, %c0_7] : memref<1x8x378xf32, #tpu.memory_space<vmem>>, vector<1x8x378xf32>
    %6 = vector.shape_cast %5 : vector<1x8x378xf32> to vector<8x378xf32>
    %7 = vector.shape_cast %4 : vector<8x378xf32> to vector<1x8x378xf32>
    tpu.vector_store %arg3[%c0_5, %c0_6, %c0_7], %7 {strides = array<i32>} : memref<1x8x378xf32, #tpu.memory_space<vmem>>, vector<1x8x378xf32>,
    %c0_8 = arith.constant 0 : index
    %c0_9 = arith.constant 0 : index
    %c1 = arith.constant 1 : index
    %8 = vector.load %arg1[%c0_8, %c0_9, %c1] : memref<1x8x600xf32, #tpu.memory_space<vmem>>, vector<1x8x378xf32>
    %9 = vector.shape_cast %8 : vector<1x8x378xf32> to vector<8x378xf32>
    %c1_10 = arith.constant 1 : index
    %c0_11 = arith.constant 0 : index
    %c0_12 = arith.constant 0 : index
    %10 = vector.load %arg2[%c1_10, %c0_11, %c0_12] : memref<27x8x8xf32, #tpu.memory_space<vmem>>, vector<1x8x8xf32>
    %11 = vector.shape_cast %10 : vector<1x8x8xf32> to vector<8x8xf32>
    %cst_13 = arith.constant dense<0.000000e+00> : vector<8x378xf32>
    %12 = tpu.matmul %11, %9, %cst_13 {dimension_numbers = #tpu.dot_dimension_numbers<[1], [0], [0], [1], [0, 0, 1, 1], [], []>} : vector<8x8xf32>, vector<8x378xf32>, vector<8x378xf32> -> vector<8x378xf32>
    %c0_14 = arith.constant 0 : index
    %c0_15 = arith.constant 0 : index
    %c0_16 = arith.constant 0 : index
    %13 = vector.load %arg3[%c0_14, %c0_15, %c0_16] : memref<1x8x378xf32, #tpu.memory_space<vmem>>, vector<1x8x378xf32>
    %14 = vector.shape_cast %13 : vector<1x8x378xf32> to vector<8x378xf32>
    %15 = arith.addf %14, %12 : vector<8x378xf32>
    %c0_17 = arith.constant 0 : index
    %c0_18 = arith.constant 0 : index
    %c0_19 = arith.constant 0 : index
    %16 = vector.load %arg3[%c0_17, %c0_18, %c0_19] : memref<1x8x378xf32, #tpu.memory_space<vmem>>, vector<1x8x378xf32>
    %17 = vector.shape_cast %16 : vector<1x8x378xf32> to vector<8x378xf32>
    %18 = vector.shape_cast %15 : vector<8x378xf32> to vector<1x8x378xf32>
    tpu.vector_store %arg3[%c0_17, %c0_18, %c0_19], %18 {strides = array<i32>} : memref<1x8x378xf32, #tpu.memory_space<vmem>>, vector<1x8x378xf32>,
    %c0_20 = arith.constant 0 : index
    %c0_21 = arith.constant 0 : index
    %c2 = arith.constant 2 : index
    %19 = vector.load %arg1[%c0_20, %c0_21, %c2] : memref<1x8x600xf32, #tpu.memory_space<vmem>>, vector<1x8x378xf32>
    %20 = vector.shape_cast %19 : vector<1x8x378xf32> to vector<8x378xf32>
    %c2_22 = arith.constant 2 : index
    %c0_23 = arith.constant 0 : index
    %c0_24 = arith.constant 0 : index
    %21 = vector.load %arg2[%c2_22, %c0_23, %c0_24] : memref<27x8x8xf32, #tpu.memory_space<vmem>>, vector<1x8x8xf32>
    %22 = vector.shape_cast %21 : vector<1x8x8xf32> to vector<8x8xf32>
    %cst_25 = arith.constant dense<0.000000e+00> : vector<8x378xf32>
    %23 = tpu.matmul %22, %20, %cst_25 {dimension_numbers = #tpu.dot_dimension_numbers<[1], [0], [0], [1], [0, 0, 1, 1], [], []>} : vector<8x8xf32>, vector<8x378xf32>, vector<8x378xf32> -> vector<8x378xf32>
    %c0_26 = arith.constant 0 : index
    %c0_27 = arith.constant 0 : index
    %c0_28 = arith.constant 0 : index
    %24 = vector.load %arg3[%c0_26, %c0_27, %c0_28] : memref<1x8x378xf32, #tpu.memory_space<vmem>>, vector<1x8x378xf32>
    %25 = vector.shape_cast %24 : vector<1x8x378xf32> to vector<8x378xf32>
    %26 = arith.addf %25, %23 : vector<8x378xf32>
    %c0_29 = arith.constant 0 : index
    %c0_30 = arith.constant 0 : index
    %c0_31 = arith.constant 0 : index
    %27 = vector.load %arg3[%c0_29, %c0_30, %c0_31] : memref<1x8x378xf32, #tpu.memory_space<vmem>>, vector<1x8x378xf32>
    %28 = vector.shape_cast %27 : vector<1x8x378xf32> to vector<8x378xf32>
    %29 = vector.shape_cast %26 : vector<8x378xf32> to vector<1x8x378xf32>
    tpu.vector_store %arg3[%c0_29, %c0_30, %c0_31], %29 {strides = array<i32>} : memref<1x8x378xf32, #tpu.memory_space<vmem>>, vector<1x8x378xf32>,
    %c0_32 = arith.constant 0 : index
    %c0_33 = arith.constant 0 : index
    %c10 = arith.constant 10 : index
    %30 = vector.load %arg1[%c0_32, %c0_33, %c10] : memref<1x8x600xf32, #tpu.memory_space<vmem>>, vector<1x8x378xf32>
    %31 = vector.shape_cast %30 : vector<1x8x378xf32> to vector<8x378xf32>
    %c3 = arith.constant 3 : index
    %c0_34 = arith.constant 0 : index
    %c0_35 = arith.constant 0 : index
    %32 = vector.load %arg2[%c3, %c0_34, %c0_35] : memref<27x8x8xf32, #tpu.memory_space<vmem>>, vector<1x8x8xf32>
    %33 = vector.shape_cast %32 : vector<1x8x8xf32> to vector<8x8xf32>
    %cst_36 = arith.constant dense<0.000000e+00> : vector<8x378xf32>
    %34 = tpu.matmul %33, %31, %cst_36 {dimension_numbers = #tpu.dot_dimension_numbers<[1], [0], [0], [1], [0, 0, 1, 1], [], []>} : vector<8x8xf32>, vector<8x378xf32>, vector<8x378xf32> -> vector<8x378xf32>
    %c0_37 = arith.constant 0 : index
    %c0_38 = arith.constant 0 : index
    %c0_39 = arith.constant 0 : index
    %35 = vector.load %arg3[%c0_37, %c0_38, %c0_39] : memref<1x8x378xf32, #tpu.memory_space<vmem>>, vector<1x8x378xf32>
    %36 = vector.shape_cast %35 : vector<1x8x378xf32> to vector<8x378xf32>
    %37 = arith.addf %36, %34 : vector<8x378xf32>
    %c0_40 = arith.constant 0 : index
    %c0_41 = arith.constant 0 : index
    %c0_42 = arith.constant 0 : index
    %38 = vector.load %arg3[%c0_40, %c0_41, %c0_42] : memref<1x8x378xf32, #tpu.memory_space<vmem>>, vector<1x8x378xf32>
    %39 = vector.shape_cast %38 : vector<1x8x378xf32> to vector<8x378xf32>
    %40 = vector.shape_cast %37 : vector<8x378xf32> to vector<1x8x378xf32>
    tpu.vector_store %arg3[%c0_40, %c0_41, %c0_42], %40 {strides = array<i32>} : memref<1x8x378xf32, #tpu.memory_space<vmem>>, vector<1x8x378xf32>,
    %c0_43 = arith.constant 0 : index
    %c0_44 = arith.constant 0 : index
    %c11 = arith.constant 11 : index
    %41 = vector.load %arg1[%c0_43, %c0_44, %c11] : memref<1x8x600xf32, #tpu.memory_space<vmem>>, vector<1x8x378xf32>
    %42 = vector.shape_cast %41 : vector<1x8x378xf32> to vector<8x378xf32>
    %c4 = arith.constant 4 : index
    %c0_45 = arith.constant 0 : index
    %c0_46 = arith.constant 0 : index
    %43 = vector.load %arg2[%c4, %c0_45, %c0_46] : memref<27x8x8xf32, #tpu.memory_space<vmem>>, vector<1x8x8xf32>
    %44 = vector.shape_cast %43 : vector<1x8x8xf32> to vector<8x8xf32>
    %cst_47 = arith.constant dense<0.000000e+00> : vector<8x378xf32>
    %45 = tpu.matmul %44, %42, %cst_47 {dimension_numbers = #tpu.dot_dimension_numbers<[1], [0], [0], [1], [0, 0, 1, 1], [], []>} : vector<8x8xf32>, vector<8x378xf32>, vector<8x378xf32> -> vector<8x378xf32>
    %c0_48 = arith.constant 0 : index
    %c0_49 = arith.constant 0 : index
    %c0_50 = arith.constant 0 : index
    %46 = vector.load %arg3[%c0_48, %c0_49, %c0_50] : memref<1x8x378xf32, #tpu.memory_space<vmem>>, vector<1x8x378xf32>
    %47 = vector.shape_cast %46 : vector<1x8x378xf32> to vector<8x378xf32>
    %48 = arith.addf %47, %45 : vector<8x378xf32>
    %c0_51 = arith.constant 0 : index
    %c0_52 = arith.constant 0 : index
    %c0_53 = arith.constant 0 : index
    %49 = vector.load %arg3[%c0_51, %c0_52, %c0_53] : memref<1x8x378xf32, #tpu.memory_space<vmem>>, vector<1x8x378xf32>
    %50 = vector.shape_cast %49 : vector<1x8x378xf32> to vector<8x378xf32>
    %51 = vector.shape_cast %48 : vector<8x378xf32> to vector<1x8x378xf32>
    tpu.vector_store %arg3[%c0_51, %c0_52, %c0_53], %51 {strides = array<i32>} : memref<1x8x378xf32, #tpu.memory_space<vmem>>, vector<1x8x378xf32>,
    %c0_54 = arith.constant 0 : index
    %c0_55 = arith.constant 0 : index
    %c12 = arith.constant 12 : index
    %52 = vector.load %arg1[%c0_54, %c0_55, %c12] : memref<1x8x600xf32, #tpu.memory_space<vmem>>, vector<1x8x378xf32>
    %53 = vector.shape_cast %52 : vector<1x8x378xf32> to vector<8x378xf32>
    %c5 = arith.constant 5 : index
    %c0_56 = arith.constant 0 : index
    %c0_57 = arith.constant 0 : index
    %54 = vector.load %arg2[%c5, %c0_56, %c0_57] : memref<27x8x8xf32, #tpu.memory_space<vmem>>, vector<1x8x8xf32>
    %55 = vector.shape_cast %54 : vector<1x8x8xf32> to vector<8x8xf32>
    %cst_58 = arith.constant dense<0.000000e+00> : vector<8x378xf32>
    %56 = tpu.matmul %55, %53, %cst_58 {dimension_numbers = #tpu.dot_dimension_numbers<[1], [0], [0], [1], [0, 0, 1, 1], [], []>} : vector<8x8xf32>, vector<8x378xf32>, vector<8x378xf32> -> vector<8x378xf32>
    %c0_59 = arith.constant 0 : index
    %c0_60 = arith.constant 0 : index
    %c0_61 = arith.constant 0 : index
    %57 = vector.load %arg3[%c0_59, %c0_60, %c0_61] : memref<1x8x378xf32, #tpu.memory_space<vmem>>, vector<1x8x378xf32>
    %58 = vector.shape_cast %57 : vector<1x8x378xf32> to vector<8x378xf32>
    %59 = arith.addf %58, %56 : vector<8x378xf32>
    %c0_62 = arith.constant 0 : index
    %c0_63 = arith.constant 0 : index
    %c0_64 = arith.constant 0 : index
    %60 = vector.load %arg3[%c0_62, %c0_63, %c0_64] : memref<1x8x378xf32, #tpu.memory_space<vmem>>, vector<1x8x378xf32>
    %61 = vector.shape_cast %60 : vector<1x8x378xf32> to vector<8x378xf32>
    %62 = vector.shape_cast %59 : vector<8x378xf32> to vector<1x8x378xf32>
    tpu.vector_store %arg3[%c0_62, %c0_63, %c0_64], %62 {strides = array<i32>} : memref<1x8x378xf32, #tpu.memory_space<vmem>>, vector<1x8x378xf32>,
    %c0_65 = arith.constant 0 : index
    %c0_66 = arith.constant 0 : index
    %c20 = arith.constant 20 : index
    %63 = vector.load %arg1[%c0_65, %c0_66, %c20] : memref<1x8x600xf32, #tpu.memory_space<vmem>>, vector<1x8x378xf32>
    %64 = vector.shape_cast %63 : vector<1x8x378xf32> to vector<8x378xf32>
    %c6 = arith.constant 6 : index
    %c0_67 = arith.constant 0 : index
    %c0_68 = arith.constant 0 : index
    %65 = vector.load %arg2[%c6, %c0_67, %c0_68] : memref<27x8x8xf32, #tpu.memory_space<vmem>>, vector<1x8x8xf32>
    %66 = vector.shape_cast %65 : vector<1x8x8xf32> to vector<8x8xf32>
    %cst_69 = arith.constant dense<0.000000e+00> : vector<8x378xf32>
    %67 = tpu.matmul %66, %64, %cst_69 {dimension_numbers = #tpu.dot_dimension_numbers<[1], [0], [0], [1], [0, 0, 1, 1], [], []>} : vector<8x8xf32>, vector<8x378xf32>, vector<8x378xf32> -> vector<8x378xf32>
    %c0_70 = arith.constant 0 : index
    %c0_71 = arith.constant 0 : index
    %c0_72 = arith.constant 0 : index
    %68 = vector.load %arg3[%c0_70, %c0_71, %c0_72] : memref<1x8x378xf32, #tpu.memory_space<vmem>>, vector<1x8x378xf32>
    %69 = vector.shape_cast %68 : vector<1x8x378xf32> to vector<8x378xf32>
    %70 = arith.addf %69, %67 : vector<8x378xf32>
    %c0_73 = arith.constant 0 : index
    %c0_74 = arith.constant 0 : index
    %c0_75 = arith.constant 0 : index
    %71 = vector.load %arg3[%c0_73, %c0_74, %c0_75] : memref<1x8x378xf32, #tpu.memory_space<vmem>>, vector<1x8x378xf32>
    %72 = vector.shape_cast %71 : vector<1x8x378xf32> to vector<8x378xf32>
    %73 = vector.shape_cast %70 : vector<8x378xf32> to vector<1x8x378xf32>
    tpu.vector_store %arg3[%c0_73, %c0_74, %c0_75], %73 {strides = array<i32>} : memref<1x8x378xf32, #tpu.memory_space<vmem>>, vector<1x8x378xf32>,
    %c0_76 = arith.constant 0 : index
    %c0_77 = arith.constant 0 : index
    %c21 = arith.constant 21 : index
    %74 = vector.load %arg1[%c0_76, %c0_77, %c21] : memref<1x8x600xf32, #tpu.memory_space<vmem>>, vector<1x8x378xf32>
    %75 = vector.shape_cast %74 : vector<1x8x378xf32> to vector<8x378xf32>
    %c7 = arith.constant 7 : index
    %c0_78 = arith.constant 0 : index
    %c0_79 = arith.constant 0 : index
    %76 = vector.load %arg2[%c7, %c0_78, %c0_79] : memref<27x8x8xf32, #tpu.memory_space<vmem>>, vector<1x8x8xf32>
    %77 = vector.shape_cast %76 : vector<1x8x8xf32> to vector<8x8xf32>
    %cst_80 = arith.constant dense<0.000000e+00> : vector<8x378xf32>
    %78 = tpu.matmul %77, %75, %cst_80 {dimension_numbers = #tpu.dot_dimension_numbers<[1], [0], [0], [1], [0, 0, 1, 1], [], []>} : vector<8x8xf32>, vector<8x378xf32>, vector<8x378xf32> -> vector<8x378xf32>
    %c0_81 = arith.constant 0 : index
    %c0_82 = arith.constant 0 : index
    %c0_83 = arith.constant 0 : index
    %79 = vector.load %arg3[%c0_81, %c0_82, %c0_83] : memref<1x8x378xf32, #tpu.memory_space<vmem>>, vector<1x8x378xf32>
    %80 = vector.shape_cast %79 : vector<1x8x378xf32> to vector<8x378xf32>
    %81 = arith.addf %80, %78 : vector<8x378xf32>
    %c0_84 = arith.constant 0 : index
    %c0_85 = arith.constant 0 : index
    %c0_86 = arith.constant 0 : index
    %82 = vector.load %arg3[%c0_84, %c0_85, %c0_86] : memref<1x8x378xf32, #tpu.memory_space<vmem>>, vector<1x8x378xf32>
    %83 = vector.shape_cast %82 : vector<1x8x378xf32> to vector<8x378xf32>
    %84 = vector.shape_cast %81 : vector<8x378xf32> to vector<1x8x378xf32>
    tpu.vector_store %arg3[%c0_84, %c0_85, %c0_86], %84 {strides = array<i32>} : memref<1x8x378xf32, #tpu.memory_space<vmem>>, vector<1x8x378xf32>,
    %c0_87 = arith.constant 0 : index
    %c0_88 = arith.constant 0 : index
    %c22 = arith.constant 22 : index
    %85 = vector.load %arg1[%c0_87, %c0_88, %c22] : memref<1x8x600xf32, #tpu.memory_space<vmem>>, vector<1x8x378xf32>
    %86 = vector.shape_cast %85 : vector<1x8x378xf32> to vector<8x378xf32>
    %c8 = arith.constant 8 : index
    %c0_89 = arith.constant 0 : index
    %c0_90 = arith.constant 0 : index
    %87 = vector.load %arg2[%c8, %c0_89, %c0_90] : memref<27x8x8xf32, #tpu.memory_space<vmem>>, vector<1x8x8xf32>
    %88 = vector.shape_cast %87 : vector<1x8x8xf32> to vector<8x8xf32>
    %cst_91 = arith.constant dense<0.000000e+00> : vector<8x378xf32>
    %89 = tpu.matmul %88, %86, %cst_91 {dimension_numbers = #tpu.dot_dimension_numbers<[1], [0], [0], [1], [0, 0, 1, 1], [], []>} : vector<8x8xf32>, vector<8x378xf32>, vector<8x378xf32> -> vector<8x378xf32>
    %c0_92 = arith.constant 0 : index
    %c0_93 = arith.constant 0 : index
    %c0_94 = arith.constant 0 : index
    %90 = vector.load %arg3[%c0_92, %c0_93, %c0_94] : memref<1x8x378xf32, #tpu.memory_space<vmem>>, vector<1x8x378xf32>
    %91 = vector.shape_cast %90 : vector<1x8x378xf32> to vector<8x378xf32>
    %92 = arith.addf %91, %89 : vector<8x378xf32>
    %c0_95 = arith.constant 0 : index
    %c0_96 = arith.constant 0 : index
    %c0_97 = arith.constant 0 : index
    %93 = vector.load %arg3[%c0_95, %c0_96, %c0_97] : memref<1x8x378xf32, #tpu.memory_space<vmem>>, vector<1x8x378xf32>
    %94 = vector.shape_cast %93 : vector<1x8x378xf32> to vector<8x378xf32>
    %95 = vector.shape_cast %92 : vector<8x378xf32> to vector<1x8x378xf32>
    tpu.vector_store %arg3[%c0_95, %c0_96, %c0_97], %95 {strides = array<i32>} : memref<1x8x378xf32, #tpu.memory_space<vmem>>, vector<1x8x378xf32>,
    %c0_98 = arith.constant 0 : index
    %c0_99 = arith.constant 0 : index
    %c100 = arith.constant 100 : index
    %96 = vector.load %arg1[%c0_98, %c0_99, %c100] : memref<1x8x600xf32, #tpu.memory_space<vmem>>, vector<1x8x378xf32>
    %97 = vector.shape_cast %96 : vector<1x8x378xf32> to vector<8x378xf32>
    %c9 = arith.constant 9 : index
    %c0_100 = arith.constant 0 : index
    %c0_101 = arith.constant 0 : index
    %98 = vector.load %arg2[%c9, %c0_100, %c0_101] : memref<27x8x8xf32, #tpu.memory_space<vmem>>, vector<1x8x8xf32>
    %99 = vector.shape_cast %98 : vector<1x8x8xf32> to vector<8x8xf32>
    %cst_102 = arith.constant dense<0.000000e+00> : vector<8x378xf32>
    %100 = tpu.matmul %99, %97, %cst_102 {dimension_numbers = #tpu.dot_dimension_numbers<[1], [0], [0], [1], [0, 0, 1, 1], [], []>} : vector<8x8xf32>, vector<8x378xf32>, vector<8x378xf32> -> vector<8x378xf32>
    %c0_103 = arith.constant 0 : index
    %c0_104 = arith.constant 0 : index
    %c0_105 = arith.constant 0 : index
    %101 = vector.load %arg3[%c0_103, %c0_104, %c0_105] : memref<1x8x378xf32, #tpu.memory_space<vmem>>, vector<1x8x378xf32>
    %102 = vector.shape_cast %101 : vector<1x8x378xf32> to vector<8x378xf32>
    %103 = arith.addf %102, %100 : vector<8x378xf32>
    %c0_106 = arith.constant 0 : index
    %c0_107 = arith.constant 0 : index
    %c0_108 = arith.constant 0 : index
    %104 = vector.load %arg3[%c0_106, %c0_107, %c0_108] : memref<1x8x378xf32, #tpu.memory_space<vmem>>, vector<1x8x378xf32>
    %105 = vector.shape_cast %104 : vector<1x8x378xf32> to vector<8x378xf32>
    %106 = vector.shape_cast %103 : vector<8x378xf32> to vector<1x8x378xf32>
    tpu.vector_store %arg3[%c0_106, %c0_107, %c0_108], %106 {strides = array<i32>} : memref<1x8x378xf32, #tpu.memory_space<vmem>>, vector<1x8x378xf32>,
    %c0_109 = arith.constant 0 : index
    %c0_110 = arith.constant 0 : index
    %c101 = arith.constant 101 : index
    %107 = vector.load %arg1[%c0_109, %c0_110, %c101] : memref<1x8x600xf32, #tpu.memory_space<vmem>>, vector<1x8x378xf32>
    %108 = vector.shape_cast %107 : vector<1x8x378xf32> to vector<8x378xf32>
    %c10_111 = arith.constant 10 : index
    %c0_112 = arith.constant 0 : index
    %c0_113 = arith.constant 0 : index
    %109 = vector.load %arg2[%c10_111, %c0_112, %c0_113] : memref<27x8x8xf32, #tpu.memory_space<vmem>>, vector<1x8x8xf32>
    %110 = vector.shape_cast %109 : vector<1x8x8xf32> to vector<8x8xf32>
    %cst_114 = arith.constant dense<0.000000e+00> : vector<8x378xf32>
    %111 = tpu.matmul %110, %108, %cst_114 {dimension_numbers = #tpu.dot_dimension_numbers<[1], [0], [0], [1], [0, 0, 1, 1], [], []>} : vector<8x8xf32>, vector<8x378xf32>, vector<8x378xf32> -> vector<8x378xf32>
    %c0_115 = arith.constant 0 : index
    %c0_116 = arith.constant 0 : index
    %c0_117 = arith.constant 0 : index
    %112 = vector.load %arg3[%c0_115, %c0_116, %c0_117] : memref<1x8x378xf32, #tpu.memory_space<vmem>>, vector<1x8x378xf32>
    %113 = vector.shape_cast %112 : vector<1x8x378xf32> to vector<8x378xf32>
    %114 = arith.addf %113, %111 : vector<8x378xf32>
    %c0_118 = arith.constant 0 : index
    %c0_119 = arith.constant 0 : index
    %c0_120 = arith.constant 0 : index
    %115 = vector.load %arg3[%c0_118, %c0_119, %c0_120] : memref<1x8x378xf32, #tpu.memory_space<vmem>>, vector<1x8x378xf32>
    %116 = vector.shape_cast %115 : vector<1x8x378xf32> to vector<8x378xf32>
    %117 = vector.shape_cast %114 : vector<8x378xf32> to vector<1x8x378xf32>
    tpu.vector_store %arg3[%c0_118, %c0_119, %c0_120], %117 {strides = array<i32>} : memref<1x8x378xf32, #tpu.memory_space<vmem>>, vector<1x8x378xf32>,
    %c0_121 = arith.constant 0 : index
    %c0_122 = arith.constant 0 : index
    %c102 = arith.constant 102 : index
    %118 = vector.load %arg1[%c0_121, %c0_122, %c102] : memref<1x8x600xf32, #tpu.memory_space<vmem>>, vector<1x8x378xf32>
    %119 = vector.shape_cast %118 : vector<1x8x378xf32> to vector<8x378xf32>
    %c11_123 = arith.constant 11 : index
    %c0_124 = arith.constant 0 : index
    %c0_125 = arith.constant 0 : index
    %120 = vector.load %arg2[%c11_123, %c0_124, %c0_125] : memref<27x8x8xf32, #tpu.memory_space<vmem>>, vector<1x8x8xf32>
    %121 = vector.shape_cast %120 : vector<1x8x8xf32> to vector<8x8xf32>
    %cst_126 = arith.constant dense<0.000000e+00> : vector<8x378xf32>
    %122 = tpu.matmul %121, %119, %cst_126 {dimension_numbers = #tpu.dot_dimension_numbers<[1], [0], [0], [1], [0, 0, 1, 1], [], []>} : vector<8x8xf32>, vector<8x378xf32>, vector<8x378xf32> -> vector<8x378xf32>
    %c0_127 = arith.constant 0 : index
    %c0_128 = arith.constant 0 : index
    %c0_129 = arith.constant 0 : index
    %123 = vector.load %arg3[%c0_127, %c0_128, %c0_129] : memref<1x8x378xf32, #tpu.memory_space<vmem>>, vector<1x8x378xf32>
    %124 = vector.shape_cast %123 : vector<1x8x378xf32> to vector<8x378xf32>
    %125 = arith.addf %124, %122 : vector<8x378xf32>
    %c0_130 = arith.constant 0 : index
    %c0_131 = arith.constant 0 : index
    %c0_132 = arith.constant 0 : index
    %126 = vector.load %arg3[%c0_130, %c0_131, %c0_132] : memref<1x8x378xf32, #tpu.memory_space<vmem>>, vector<1x8x378xf32>
    %127 = vector.shape_cast %126 : vector<1x8x378xf32> to vector<8x378xf32>
    %128 = vector.shape_cast %125 : vector<8x378xf32> to vector<1x8x378xf32>
    tpu.vector_store %arg3[%c0_130, %c0_131, %c0_132], %128 {strides = array<i32>} : memref<1x8x378xf32, #tpu.memory_space<vmem>>, vector<1x8x378xf32>,
    %c0_133 = arith.constant 0 : index
    %c0_134 = arith.constant 0 : index
    %c110 = arith.constant 110 : index
    %129 = vector.load %arg1[%c0_133, %c0_134, %c110] : memref<1x8x600xf32, #tpu.memory_space<vmem>>, vector<1x8x378xf32>
    %130 = vector.shape_cast %129 : vector<1x8x378xf32> to vector<8x378xf32>
    %c12_135 = arith.constant 12 : index
    %c0_136 = arith.constant 0 : index
    %c0_137 = arith.constant 0 : index
    %131 = vector.load %arg2[%c12_135, %c0_136, %c0_137] : memref<27x8x8xf32, #tpu.memory_space<vmem>>, vector<1x8x8xf32>
    %132 = vector.shape_cast %131 : vector<1x8x8xf32> to vector<8x8xf32>
    %cst_138 = arith.constant dense<0.000000e+00> : vector<8x378xf32>
    %133 = tpu.matmul %132, %130, %cst_138 {dimension_numbers = #tpu.dot_dimension_numbers<[1], [0], [0], [1], [0, 0, 1, 1], [], []>} : vector<8x8xf32>, vector<8x378xf32>, vector<8x378xf32> -> vector<8x378xf32>
    %c0_139 = arith.constant 0 : index
    %c0_140 = arith.constant 0 : index
    %c0_141 = arith.constant 0 : index
    %134 = vector.load %arg3[%c0_139, %c0_140, %c0_141] : memref<1x8x378xf32, #tpu.memory_space<vmem>>, vector<1x8x378xf32>
    %135 = vector.shape_cast %134 : vector<1x8x378xf32> to vector<8x378xf32>
    %136 = arith.addf %135, %133 : vector<8x378xf32>
    %c0_142 = arith.constant 0 : index
    %c0_143 = arith.constant 0 : index
    %c0_144 = arith.constant 0 : index
    %137 = vector.load %arg3[%c0_142, %c0_143, %c0_144] : memref<1x8x378xf32, #tpu.memory_space<vmem>>, vector<1x8x378xf32>
    %138 = vector.shape_cast %137 : vector<1x8x378xf32> to vector<8x378xf32>
    %139 = vector.shape_cast %136 : vector<8x378xf32> to vector<1x8x378xf32>
    tpu.vector_store %arg3[%c0_142, %c0_143, %c0_144], %139 {strides = array<i32>} : memref<1x8x378xf32, #tpu.memory_space<vmem>>, vector<1x8x378xf32>,
    %c0_145 = arith.constant 0 : index
    %c0_146 = arith.constant 0 : index
    %c111 = arith.constant 111 : index
    %140 = vector.load %arg1[%c0_145, %c0_146, %c111] : memref<1x8x600xf32, #tpu.memory_space<vmem>>, vector<1x8x378xf32>
    %141 = vector.shape_cast %140 : vector<1x8x378xf32> to vector<8x378xf32>
    %c13 = arith.constant 13 : index
    %c0_147 = arith.constant 0 : index
    %c0_148 = arith.constant 0 : index
    %142 = vector.load %arg2[%c13, %c0_147, %c0_148] : memref<27x8x8xf32, #tpu.memory_space<vmem>>, vector<1x8x8xf32>
    %143 = vector.shape_cast %142 : vector<1x8x8xf32> to vector<8x8xf32>
    %cst_149 = arith.constant dense<0.000000e+00> : vector<8x378xf32>
    %144 = tpu.matmul %143, %141, %cst_149 {dimension_numbers = #tpu.dot_dimension_numbers<[1], [0], [0], [1], [0, 0, 1, 1], [], []>} : vector<8x8xf32>, vector<8x378xf32>, vector<8x378xf32> -> vector<8x378xf32>
    %c0_150 = arith.constant 0 : index
    %c0_151 = arith.constant 0 : index
    %c0_152 = arith.constant 0 : index
    %145 = vector.load %arg3[%c0_150, %c0_151, %c0_152] : memref<1x8x378xf32, #tpu.memory_space<vmem>>, vector<1x8x378xf32>
    %146 = vector.shape_cast %145 : vector<1x8x378xf32> to vector<8x378xf32>
    %147 = arith.addf %146, %144 : vector<8x378xf32>
    %c0_153 = arith.constant 0 : index
    %c0_154 = arith.constant 0 : index
    %c0_155 = arith.constant 0 : index
    %148 = vector.load %arg3[%c0_153, %c0_154, %c0_155] : memref<1x8x378xf32, #tpu.memory_space<vmem>>, vector<1x8x378xf32>
    %149 = vector.shape_cast %148 : vector<1x8x378xf32> to vector<8x378xf32>
    %150 = vector.shape_cast %147 : vector<8x378xf32> to vector<1x8x378xf32>
    tpu.vector_store %arg3[%c0_153, %c0_154, %c0_155], %150 {strides = array<i32>} : memref<1x8x378xf32, #tpu.memory_space<vmem>>, vector<1x8x378xf32>,
    %c0_156 = arith.constant 0 : index
    %c0_157 = arith.constant 0 : index
    %c112 = arith.constant 112 : index
    %151 = vector.load %arg1[%c0_156, %c0_157, %c112] : memref<1x8x600xf32, #tpu.memory_space<vmem>>, vector<1x8x378xf32>
    %152 = vector.shape_cast %151 : vector<1x8x378xf32> to vector<8x378xf32>
    %c14 = arith.constant 14 : index
    %c0_158 = arith.constant 0 : index
    %c0_159 = arith.constant 0 : index
    %153 = vector.load %arg2[%c14, %c0_158, %c0_159] : memref<27x8x8xf32, #tpu.memory_space<vmem>>, vector<1x8x8xf32>
    %154 = vector.shape_cast %153 : vector<1x8x8xf32> to vector<8x8xf32>
    %cst_160 = arith.constant dense<0.000000e+00> : vector<8x378xf32>
    %155 = tpu.matmul %154, %152, %cst_160 {dimension_numbers = #tpu.dot_dimension_numbers<[1], [0], [0], [1], [0, 0, 1, 1], [], []>} : vector<8x8xf32>, vector<8x378xf32>, vector<8x378xf32> -> vector<8x378xf32>
    %c0_161 = arith.constant 0 : index
    %c0_162 = arith.constant 0 : index
    %c0_163 = arith.constant 0 : index
    %156 = vector.load %arg3[%c0_161, %c0_162, %c0_163] : memref<1x8x378xf32, #tpu.memory_space<vmem>>, vector<1x8x378xf32>
    %157 = vector.shape_cast %156 : vector<1x8x378xf32> to vector<8x378xf32>
    %158 = arith.addf %157, %155 : vector<8x378xf32>
    %c0_164 = arith.constant 0 : index
    %c0_165 = arith.constant 0 : index
    %c0_166 = arith.constant 0 : index
    %159 = vector.load %arg3[%c0_164, %c0_165, %c0_166] : memref<1x8x378xf32, #tpu.memory_space<vmem>>, vector<1x8x378xf32>
    %160 = vector.shape_cast %159 : vector<1x8x378xf32> to vector<8x378xf32>
    %161 = vector.shape_cast %158 : vector<8x378xf32> to vector<1x8x378xf32>
    tpu.vector_store %arg3[%c0_164, %c0_165, %c0_166], %161 {strides = array<i32>} : memref<1x8x378xf32, #tpu.memory_space<vmem>>, vector<1x8x378xf32>,
    %c0_167 = arith.constant 0 : index
    %c0_168 = arith.constant 0 : index
    %c120 = arith.constant 120 : index
    %162 = vector.load %arg1[%c0_167, %c0_168, %c120] : memref<1x8x600xf32, #tpu.memory_space<vmem>>, vector<1x8x378xf32>
    %163 = vector.shape_cast %162 : vector<1x8x378xf32> to vector<8x378xf32>
    %c15 = arith.constant 15 : index
    %c0_169 = arith.constant 0 : index
    %c0_170 = arith.constant 0 : index
    %164 = vector.load %arg2[%c15, %c0_169, %c0_170] : memref<27x8x8xf32, #tpu.memory_space<vmem>>, vector<1x8x8xf32>
    %165 = vector.shape_cast %164 : vector<1x8x8xf32> to vector<8x8xf32>
    %cst_171 = arith.constant dense<0.000000e+00> : vector<8x378xf32>
    %166 = tpu.matmul %165, %163, %cst_171 {dimension_numbers = #tpu.dot_dimension_numbers<[1], [0], [0], [1], [0, 0, 1, 1], [], []>} : vector<8x8xf32>, vector<8x378xf32>, vector<8x378xf32> -> vector<8x378xf32>
    %c0_172 = arith.constant 0 : index
    %c0_173 = arith.constant 0 : index
    %c0_174 = arith.constant 0 : index
    %167 = vector.load %arg3[%c0_172, %c0_173, %c0_174] : memref<1x8x378xf32, #tpu.memory_space<vmem>>, vector<1x8x378xf32>
    %168 = vector.shape_cast %167 : vector<1x8x378xf32> to vector<8x378xf32>
    %169 = arith.addf %168, %166 : vector<8x378xf32>
    %c0_175 = arith.constant 0 : index
    %c0_176 = arith.constant 0 : index
    %c0_177 = arith.constant 0 : index
    %170 = vector.load %arg3[%c0_175, %c0_176, %c0_177] : memref<1x8x378xf32, #tpu.memory_space<vmem>>, vector<1x8x378xf32>
    %171 = vector.shape_cast %170 : vector<1x8x378xf32> to vector<8x378xf32>
    %172 = vector.shape_cast %169 : vector<8x378xf32> to vector<1x8x378xf32>
    tpu.vector_store %arg3[%c0_175, %c0_176, %c0_177], %172 {strides = array<i32>} : memref<1x8x378xf32, #tpu.memory_space<vmem>>, vector<1x8x378xf32>,
    %c0_178 = arith.constant 0 : index
    %c0_179 = arith.constant 0 : index
    %c121 = arith.constant 121 : index
    %173 = vector.load %arg1[%c0_178, %c0_179, %c121] : memref<1x8x600xf32, #tpu.memory_space<vmem>>, vector<1x8x378xf32>
    %174 = vector.shape_cast %173 : vector<1x8x378xf32> to vector<8x378xf32>
    %c16 = arith.constant 16 : index
    %c0_180 = arith.constant 0 : index
    %c0_181 = arith.constant 0 : index
    %175 = vector.load %arg2[%c16, %c0_180, %c0_181] : memref<27x8x8xf32, #tpu.memory_space<vmem>>, vector<1x8x8xf32>
    %176 = vector.shape_cast %175 : vector<1x8x8xf32> to vector<8x8xf32>
    %cst_182 = arith.constant dense<0.000000e+00> : vector<8x378xf32>
    %177 = tpu.matmul %176, %174, %cst_182 {dimension_numbers = #tpu.dot_dimension_numbers<[1], [0], [0], [1], [0, 0, 1, 1], [], []>} : vector<8x8xf32>, vector<8x378xf32>, vector<8x378xf32> -> vector<8x378xf32>
    %c0_183 = arith.constant 0 : index
    %c0_184 = arith.constant 0 : index
    %c0_185 = arith.constant 0 : index
    %178 = vector.load %arg3[%c0_183, %c0_184, %c0_185] : memref<1x8x378xf32, #tpu.memory_space<vmem>>, vector<1x8x378xf32>
    %179 = vector.shape_cast %178 : vector<1x8x378xf32> to vector<8x378xf32>
    %180 = arith.addf %179, %177 : vector<8x378xf32>
    %c0_186 = arith.constant 0 : index
    %c0_187 = arith.constant 0 : index
    %c0_188 = arith.constant 0 : index
    %181 = vector.load %arg3[%c0_186, %c0_187, %c0_188] : memref<1x8x378xf32, #tpu.memory_space<vmem>>, vector<1x8x378xf32>
    %182 = vector.shape_cast %181 : vector<1x8x378xf32> to vector<8x378xf32>
    %183 = vector.shape_cast %180 : vector<8x378xf32> to vector<1x8x378xf32>
    tpu.vector_store %arg3[%c0_186, %c0_187, %c0_188], %183 {strides = array<i32>} : memref<1x8x378xf32, #tpu.memory_space<vmem>>, vector<1x8x378xf32>,
    %c0_189 = arith.constant 0 : index
    %c0_190 = arith.constant 0 : index
    %c122 = arith.constant 122 : index
    %184 = vector.load %arg1[%c0_189, %c0_190, %c122] : memref<1x8x600xf32, #tpu.memory_space<vmem>>, vector<1x8x378xf32>
    %185 = vector.shape_cast %184 : vector<1x8x378xf32> to vector<8x378xf32>
    %c17 = arith.constant 17 : index
    %c0_191 = arith.constant 0 : index
    %c0_192 = arith.constant 0 : index
    %186 = vector.load %arg2[%c17, %c0_191, %c0_192] : memref<27x8x8xf32, #tpu.memory_space<vmem>>, vector<1x8x8xf32>
    %187 = vector.shape_cast %186 : vector<1x8x8xf32> to vector<8x8xf32>
    %cst_193 = arith.constant dense<0.000000e+00> : vector<8x378xf32>
    %188 = tpu.matmul %187, %185, %cst_193 {dimension_numbers = #tpu.dot_dimension_numbers<[1], [0], [0], [1], [0, 0, 1, 1], [], []>} : vector<8x8xf32>, vector<8x378xf32>, vector<8x378xf32> -> vector<8x378xf32>
    %c0_194 = arith.constant 0 : index
    %c0_195 = arith.constant 0 : index
    %c0_196 = arith.constant 0 : index
    %189 = vector.load %arg3[%c0_194, %c0_195, %c0_196] : memref<1x8x378xf32, #tpu.memory_space<vmem>>, vector<1x8x378xf32>
    %190 = vector.shape_cast %189 : vector<1x8x378xf32> to vector<8x378xf32>
    %191 = arith.addf %190, %188 : vector<8x378xf32>
    %c0_197 = arith.constant 0 : index
    %c0_198 = arith.constant 0 : index
    %c0_199 = arith.constant 0 : index
    %192 = vector.load %arg3[%c0_197, %c0_198, %c0_199] : memref<1x8x378xf32, #tpu.memory_space<vmem>>, vector<1x8x378xf32>
    %193 = vector.shape_cast %192 : vector<1x8x378xf32> to vector<8x378xf32>
    %194 = vector.shape_cast %191 : vector<8x378xf32> to vector<1x8x378xf32>
    tpu.vector_store %arg3[%c0_197, %c0_198, %c0_199], %194 {strides = array<i32>} : memref<1x8x378xf32, #tpu.memory_space<vmem>>, vector<1x8x378xf32>,
    %c0_200 = arith.constant 0 : index
    %c0_201 = arith.constant 0 : index
    %c200 = arith.constant 200 : index
    %195 = vector.load %arg1[%c0_200, %c0_201, %c200] : memref<1x8x600xf32, #tpu.memory_space<vmem>>, vector<1x8x378xf32>
    %196 = vector.shape_cast %195 : vector<1x8x378xf32> to vector<8x378xf32>
    %c18 = arith.constant 18 : index
    %c0_202 = arith.constant 0 : index
    %c0_203 = arith.constant 0 : index
    %197 = vector.load %arg2[%c18, %c0_202, %c0_203] : memref<27x8x8xf32, #tpu.memory_space<vmem>>, vector<1x8x8xf32>
    %198 = vector.shape_cast %197 : vector<1x8x8xf32> to vector<8x8xf32>
    %cst_204 = arith.constant dense<0.000000e+00> : vector<8x378xf32>
    %199 = tpu.matmul %198, %196, %cst_204 {dimension_numbers = #tpu.dot_dimension_numbers<[1], [0], [0], [1], [0, 0, 1, 1], [], []>} : vector<8x8xf32>, vector<8x378xf32>, vector<8x378xf32> -> vector<8x378xf32>
    %c0_205 = arith.constant 0 : index
    %c0_206 = arith.constant 0 : index
    %c0_207 = arith.constant 0 : index
    %200 = vector.load %arg3[%c0_205, %c0_206, %c0_207] : memref<1x8x378xf32, #tpu.memory_space<vmem>>, vector<1x8x378xf32>
    %201 = vector.shape_cast %200 : vector<1x8x378xf32> to vector<8x378xf32>
    %202 = arith.addf %201, %199 : vector<8x378xf32>
    %c0_208 = arith.constant 0 : index
    %c0_209 = arith.constant 0 : index
    %c0_210 = arith.constant 0 : index
    %203 = vector.load %arg3[%c0_208, %c0_209, %c0_210] : memref<1x8x378xf32, #tpu.memory_space<vmem>>, vector<1x8x378xf32>
    %204 = vector.shape_cast %203 : vector<1x8x378xf32> to vector<8x378xf32>
    %205 = vector.shape_cast %202 : vector<8x378xf32> to vector<1x8x378xf32>
    tpu.vector_store %arg3[%c0_208, %c0_209, %c0_210], %205 {strides = array<i32>} : memref<1x8x378xf32, #tpu.memory_space<vmem>>, vector<1x8x378xf32>,
    %c0_211 = arith.constant 0 : index
    %c0_212 = arith.constant 0 : index
    %c201 = arith.constant 201 : index
    %206 = vector.load %arg1[%c0_211, %c0_212, %c201] : memref<1x8x600xf32, #tpu.memory_space<vmem>>, vector<1x8x378xf32>
    %207 = vector.shape_cast %206 : vector<1x8x378xf32> to vector<8x378xf32>
    %c19 = arith.constant 19 : index
    %c0_213 = arith.constant 0 : index
    %c0_214 = arith.constant 0 : index
    %208 = vector.load %arg2[%c19, %c0_213, %c0_214] : memref<27x8x8xf32, #tpu.memory_space<vmem>>, vector<1x8x8xf32>
    %209 = vector.shape_cast %208 : vector<1x8x8xf32> to vector<8x8xf32>
    %cst_215 = arith.constant dense<0.000000e+00> : vector<8x378xf32>
    %210 = tpu.matmul %209, %207, %cst_215 {dimension_numbers = #tpu.dot_dimension_numbers<[1], [0], [0], [1], [0, 0, 1, 1], [], []>} : vector<8x8xf32>, vector<8x378xf32>, vector<8x378xf32> -> vector<8x378xf32>
    %c0_216 = arith.constant 0 : index
    %c0_217 = arith.constant 0 : index
    %c0_218 = arith.constant 0 : index
    %211 = vector.load %arg3[%c0_216, %c0_217, %c0_218] : memref<1x8x378xf32, #tpu.memory_space<vmem>>, vector<1x8x378xf32>
    %212 = vector.shape_cast %211 : vector<1x8x378xf32> to vector<8x378xf32>
    %213 = arith.addf %212, %210 : vector<8x378xf32>
    %c0_219 = arith.constant 0 : index
    %c0_220 = arith.constant 0 : index
    %c0_221 = arith.constant 0 : index
    %214 = vector.load %arg3[%c0_219, %c0_220, %c0_221] : memref<1x8x378xf32, #tpu.memory_space<vmem>>, vector<1x8x378xf32>
    %215 = vector.shape_cast %214 : vector<1x8x378xf32> to vector<8x378xf32>
    %216 = vector.shape_cast %213 : vector<8x378xf32> to vector<1x8x378xf32>
    tpu.vector_store %arg3[%c0_219, %c0_220, %c0_221], %216 {strides = array<i32>} : memref<1x8x378xf32, #tpu.memory_space<vmem>>, vector<1x8x378xf32>,
    %c0_222 = arith.constant 0 : index
    %c0_223 = arith.constant 0 : index
    %c202 = arith.constant 202 : index
    %217 = vector.load %arg1[%c0_222, %c0_223, %c202] : memref<1x8x600xf32, #tpu.memory_space<vmem>>, vector<1x8x378xf32>
    %218 = vector.shape_cast %217 : vector<1x8x378xf32> to vector<8x378xf32>
    %c20_224 = arith.constant 20 : index
    %c0_225 = arith.constant 0 : index
    %c0_226 = arith.constant 0 : index
    %219 = vector.load %arg2[%c20_224, %c0_225, %c0_226] : memref<27x8x8xf32, #tpu.memory_space<vmem>>, vector<1x8x8xf32>
    %220 = vector.shape_cast %219 : vector<1x8x8xf32> to vector<8x8xf32>
    %cst_227 = arith.constant dense<0.000000e+00> : vector<8x378xf32>
    %221 = tpu.matmul %220, %218, %cst_227 {dimension_numbers = #tpu.dot_dimension_numbers<[1], [0], [0], [1], [0, 0, 1, 1], [], []>} : vector<8x8xf32>, vector<8x378xf32>, vector<8x378xf32> -> vector<8x378xf32>
    %c0_228 = arith.constant 0 : index
    %c0_229 = arith.constant 0 : index
    %c0_230 = arith.constant 0 : index
    %222 = vector.load %arg3[%c0_228, %c0_229, %c0_230] : memref<1x8x378xf32, #tpu.memory_space<vmem>>, vector<1x8x378xf32>
    %223 = vector.shape_cast %222 : vector<1x8x378xf32> to vector<8x378xf32>
    %224 = arith.addf %223, %221 : vector<8x378xf32>
    %c0_231 = arith.constant 0 : index
    %c0_232 = arith.constant 0 : index
    %c0_233 = arith.constant 0 : index
    %225 = vector.load %arg3[%c0_231, %c0_232, %c0_233] : memref<1x8x378xf32, #tpu.memory_space<vmem>>, vector<1x8x378xf32>
    %226 = vector.shape_cast %225 : vector<1x8x378xf32> to vector<8x378xf32>
    %227 = vector.shape_cast %224 : vector<8x378xf32> to vector<1x8x378xf32>
    tpu.vector_store %arg3[%c0_231, %c0_232, %c0_233], %227 {strides = array<i32>} : memref<1x8x378xf32, #tpu.memory_space<vmem>>, vector<1x8x378xf32>,
    %c0_234 = arith.constant 0 : index
    %c0_235 = arith.constant 0 : index
    %c210 = arith.constant 210 : index
    %228 = vector.load %arg1[%c0_234, %c0_235, %c210] : memref<1x8x600xf32, #tpu.memory_space<vmem>>, vector<1x8x378xf32>
    %229 = vector.shape_cast %228 : vector<1x8x378xf32> to vector<8x378xf32>
    %c21_236 = arith.constant 21 : index
    %c0_237 = arith.constant 0 : index
    %c0_238 = arith.constant 0 : index
    %230 = vector.load %arg2[%c21_236, %c0_237, %c0_238] : memref<27x8x8xf32, #tpu.memory_space<vmem>>, vector<1x8x8xf32>
    %231 = vector.shape_cast %230 : vector<1x8x8xf32> to vector<8x8xf32>
    %cst_239 = arith.constant dense<0.000000e+00> : vector<8x378xf32>
    %232 = tpu.matmul %231, %229, %cst_239 {dimension_numbers = #tpu.dot_dimension_numbers<[1], [0], [0], [1], [0, 0, 1, 1], [], []>} : vector<8x8xf32>, vector<8x378xf32>, vector<8x378xf32> -> vector<8x378xf32>
    %c0_240 = arith.constant 0 : index
    %c0_241 = arith.constant 0 : index
    %c0_242 = arith.constant 0 : index
    %233 = vector.load %arg3[%c0_240, %c0_241, %c0_242] : memref<1x8x378xf32, #tpu.memory_space<vmem>>, vector<1x8x378xf32>
    %234 = vector.shape_cast %233 : vector<1x8x378xf32> to vector<8x378xf32>
    %235 = arith.addf %234, %232 : vector<8x378xf32>
    %c0_243 = arith.constant 0 : index
    %c0_244 = arith.constant 0 : index
    %c0_245 = arith.constant 0 : index
    %236 = vector.load %arg3[%c0_243, %c0_244, %c0_245] : memref<1x8x378xf32, #tpu.memory_space<vmem>>, vector<1x8x378xf32>
    %237 = vector.shape_cast %236 : vector<1x8x378xf32> to vector<8x378xf32>
    %238 = vector.shape_cast %235 : vector<8x378xf32> to vector<1x8x378xf32>
    tpu.vector_store %arg3[%c0_243, %c0_244, %c0_245], %238 {strides = array<i32>} : memref<1x8x378xf32, #tpu.memory_space<vmem>>, vector<1x8x378xf32>,
    %c0_246 = arith.constant 0 : index
    %c0_247 = arith.constant 0 : index
    %c211 = arith.constant 211 : index
    %239 = vector.load %arg1[%c0_246, %c0_247, %c211] : memref<1x8x600xf32, #tpu.memory_space<vmem>>, vector<1x8x378xf32>
    %240 = vector.shape_cast %239 : vector<1x8x378xf32> to vector<8x378xf32>
    %c22_248 = arith.constant 22 : index
    %c0_249 = arith.constant 0 : index
    %c0_250 = arith.constant 0 : index
    %241 = vector.load %arg2[%c22_248, %c0_249, %c0_250] : memref<27x8x8xf32, #tpu.memory_space<vmem>>, vector<1x8x8xf32>
    %242 = vector.shape_cast %241 : vector<1x8x8xf32> to vector<8x8xf32>
    %cst_251 = arith.constant dense<0.000000e+00> : vector<8x378xf32>
    %243 = tpu.matmul %242, %240, %cst_251 {dimension_numbers = #tpu.dot_dimension_numbers<[1], [0], [0], [1], [0, 0, 1, 1], [], []>} : vector<8x8xf32>, vector<8x378xf32>, vector<8x378xf32> -> vector<8x378xf32>
    %c0_252 = arith.constant 0 : index
    %c0_253 = arith.constant 0 : index
    %c0_254 = arith.constant 0 : index
    %244 = vector.load %arg3[%c0_252, %c0_253, %c0_254] : memref<1x8x378xf32, #tpu.memory_space<vmem>>, vector<1x8x378xf32>
    %245 = vector.shape_cast %244 : vector<1x8x378xf32> to vector<8x378xf32>
    %246 = arith.addf %245, %243 : vector<8x378xf32>
    %c0_255 = arith.constant 0 : index
    %c0_256 = arith.constant 0 : index
    %c0_257 = arith.constant 0 : index
    %247 = vector.load %arg3[%c0_255, %c0_256, %c0_257] : memref<1x8x378xf32, #tpu.memory_space<vmem>>, vector<1x8x378xf32>
    %248 = vector.shape_cast %247 : vector<1x8x378xf32> to vector<8x378xf32>
    %249 = vector.shape_cast %246 : vector<8x378xf32> to vector<1x8x378xf32>
    tpu.vector_store %arg3[%c0_255, %c0_256, %c0_257], %249 {strides = array<i32>} : memref<1x8x378xf32, #tpu.memory_space<vmem>>, vector<1x8x378xf32>,
    %c0_258 = arith.constant 0 : index
    %c0_259 = arith.constant 0 : index
    %c212 = arith.constant 212 : index
    %250 = vector.load %arg1[%c0_258, %c0_259, %c212] : memref<1x8x600xf32, #tpu.memory_space<vmem>>, vector<1x8x378xf32>
    %251 = vector.shape_cast %250 : vector<1x8x378xf32> to vector<8x378xf32>
    %c23 = arith.constant 23 : index
    %c0_260 = arith.constant 0 : index
    %c0_261 = arith.constant 0 : index
    %252 = vector.load %arg2[%c23, %c0_260, %c0_261] : memref<27x8x8xf32, #tpu.memory_space<vmem>>, vector<1x8x8xf32>
    %253 = vector.shape_cast %252 : vector<1x8x8xf32> to vector<8x8xf32>
    %cst_262 = arith.constant dense<0.000000e+00> : vector<8x378xf32>
    %254 = tpu.matmul %253, %251, %cst_262 {dimension_numbers = #tpu.dot_dimension_numbers<[1], [0], [0], [1], [0, 0, 1, 1], [], []>} : vector<8x8xf32>, vector<8x378xf32>, vector<8x378xf32> -> vector<8x378xf32>
    %c0_263 = arith.constant 0 : index
    %c0_264 = arith.constant 0 : index
    %c0_265 = arith.constant 0 : index
    %255 = vector.load %arg3[%c0_263, %c0_264, %c0_265] : memref<1x8x378xf32, #tpu.memory_space<vmem>>, vector<1x8x378xf32>
    %256 = vector.shape_cast %255 : vector<1x8x378xf32> to vector<8x378xf32>
    %257 = arith.addf %256, %254 : vector<8x378xf32>
    %c0_266 = arith.constant 0 : index
    %c0_267 = arith.constant 0 : index
    %c0_268 = arith.constant 0 : index
    %258 = vector.load %arg3[%c0_266, %c0_267, %c0_268] : memref<1x8x378xf32, #tpu.memory_space<vmem>>, vector<1x8x378xf32>
    %259 = vector.shape_cast %258 : vector<1x8x378xf32> to vector<8x378xf32>
    %260 = vector.shape_cast %257 : vector<8x378xf32> to vector<1x8x378xf32>
    tpu.vector_store %arg3[%c0_266, %c0_267, %c0_268], %260 {strides = array<i32>} : memref<1x8x378xf32, #tpu.memory_space<vmem>>, vector<1x8x378xf32>,
    %c0_269 = arith.constant 0 : index
    %c0_270 = arith.constant 0 : index
    %c220 = arith.constant 220 : index
    %261 = vector.load %arg1[%c0_269, %c0_270, %c220] : memref<1x8x600xf32, #tpu.memory_space<vmem>>, vector<1x8x378xf32>
    %262 = vector.shape_cast %261 : vector<1x8x378xf32> to vector<8x378xf32>
    %c24 = arith.constant 24 : index
    %c0_271 = arith.constant 0 : index
    %c0_272 = arith.constant 0 : index
    %263 = vector.load %arg2[%c24, %c0_271, %c0_272] : memref<27x8x8xf32, #tpu.memory_space<vmem>>, vector<1x8x8xf32>
    %264 = vector.shape_cast %263 : vector<1x8x8xf32> to vector<8x8xf32>
    %cst_273 = arith.constant dense<0.000000e+00> : vector<8x378xf32>
    %265 = tpu.matmul %264, %262, %cst_273 {dimension_numbers = #tpu.dot_dimension_numbers<[1], [0], [0], [1], [0, 0, 1, 1], [], []>} : vector<8x8xf32>, vector<8x378xf32>, vector<8x378xf32> -> vector<8x378xf32>
    %c0_274 = arith.constant 0 : index
    %c0_275 = arith.constant 0 : index
    %c0_276 = arith.constant 0 : index
    %266 = vector.load %arg3[%c0_274, %c0_275, %c0_276] : memref<1x8x378xf32, #tpu.memory_space<vmem>>, vector<1x8x378xf32>
    %267 = vector.shape_cast %266 : vector<1x8x378xf32> to vector<8x378xf32>
    %268 = arith.addf %267, %265 : vector<8x378xf32>
    %c0_277 = arith.constant 0 : index
    %c0_278 = arith.constant 0 : index
    %c0_279 = arith.constant 0 : index
    %269 = vector.load %arg3[%c0_277, %c0_278, %c0_279] : memref<1x8x378xf32, #tpu.memory_space<vmem>>, vector<1x8x378xf32>
    %270 = vector.shape_cast %269 : vector<1x8x378xf32> to vector<8x378xf32>
    %271 = vector.shape_cast %268 : vector<8x378xf32> to vector<1x8x378xf32>
    tpu.vector_store %arg3[%c0_277, %c0_278, %c0_279], %271 {strides = array<i32>} : memref<1x8x378xf32, #tpu.memory_space<vmem>>, vector<1x8x378xf32>,
    %c0_280 = arith.constant 0 : index
    %c0_281 = arith.constant 0 : index
    %c221 = arith.constant 221 : index
    %272 = vector.load %arg1[%c0_280, %c0_281, %c221] : memref<1x8x600xf32, #tpu.memory_space<vmem>>, vector<1x8x378xf32>
    %273 = vector.shape_cast %272 : vector<1x8x378xf32> to vector<8x378xf32>
    %c25 = arith.constant 25 : index
    %c0_282 = arith.constant 0 : index
    %c0_283 = arith.constant 0 : index
    %274 = vector.load %arg2[%c25, %c0_282, %c0_283] : memref<27x8x8xf32, #tpu.memory_space<vmem>>, vector<1x8x8xf32>
    %275 = vector.shape_cast %274 : vector<1x8x8xf32> to vector<8x8xf32>
    %cst_284 = arith.constant dense<0.000000e+00> : vector<8x378xf32>
    %276 = tpu.matmul %275, %273, %cst_284 {dimension_numbers = #tpu.dot_dimension_numbers<[1], [0], [0], [1], [0, 0, 1, 1], [], []>} : vector<8x8xf32>, vector<8x378xf32>, vector<8x378xf32> -> vector<8x378xf32>
    %c0_285 = arith.constant 0 : index
    %c0_286 = arith.constant 0 : index
    %c0_287 = arith.constant 0 : index
    %277 = vector.load %arg3[%c0_285, %c0_286, %c0_287] : memref<1x8x378xf32, #tpu.memory_space<vmem>>, vector<1x8x378xf32>
    %278 = vector.shape_cast %277 : vector<1x8x378xf32> to vector<8x378xf32>
    %279 = arith.addf %278, %276 : vector<8x378xf32>
    %c0_288 = arith.constant 0 : index
    %c0_289 = arith.constant 0 : index
    %c0_290 = arith.constant 0 : index
    %280 = vector.load %arg3[%c0_288, %c0_289, %c0_290] : memref<1x8x378xf32, #tpu.memory_space<vmem>>, vector<1x8x378xf32>
    %281 = vector.shape_cast %280 : vector<1x8x378xf32> to vector<8x378xf32>
    %282 = vector.shape_cast %279 : vector<8x378xf32> to vector<1x8x378xf32>
    tpu.vector_store %arg3[%c0_288, %c0_289, %c0_290], %282 {strides = array<i32>} : memref<1x8x378xf32, #tpu.memory_space<vmem>>, vector<1x8x378xf32>,
    %c0_291 = arith.constant 0 : index
    %c0_292 = arith.constant 0 : index
    %c222 = arith.constant 222 : index
    %283 = vector.load %arg1[%c0_291, %c0_292, %c222] : memref<1x8x600xf32, #tpu.memory_space<vmem>>, vector<1x8x378xf32>
    %284 = vector.shape_cast %283 : vector<1x8x378xf32> to vector<8x378xf32>
    %c26 = arith.constant 26 : index
    %c0_293 = arith.constant 0 : index
    %c0_294 = arith.constant 0 : index
    %285 = vector.load %arg2[%c26, %c0_293, %c0_294] : memref<27x8x8xf32, #tpu.memory_space<vmem>>, vector<1x8x8xf32>
    %286 = vector.shape_cast %285 : vector<1x8x8xf32> to vector<8x8xf32>
    %cst_295 = arith.constant dense<0.000000e+00> : vector<8x378xf32>
    %287 = tpu.matmul %286, %284, %cst_295 {dimension_numbers = #tpu.dot_dimension_numbers<[1], [0], [0], [1], [0, 0, 1, 1], [], []>} : vector<8x8xf32>, vector<8x378xf32>, vector<8x378xf32> -> vector<8x378xf32>
    %c0_296 = arith.constant 0 : index
    %c0_297 = arith.constant 0 : index
    %c0_298 = arith.constant 0 : index
    %288 = vector.load %arg3[%c0_296, %c0_297, %c0_298] : memref<1x8x378xf32, #tpu.memory_space<vmem>>, vector<1x8x378xf32>
    %289 = vector.shape_cast %288 : vector<1x8x378xf32> to vector<8x378xf32>
    %290 = arith.addf %289, %287 : vector<8x378xf32>
    %c0_299 = arith.constant 0 : index
    %c0_300 = arith.constant 0 : index
    %c0_301 = arith.constant 0 : index
    %291 = vector.load %arg3[%c0_299, %c0_300, %c0_301] : memref<1x8x378xf32, #tpu.memory_space<vmem>>, vector<1x8x378xf32>
    %292 = vector.shape_cast %291 : vector<1x8x378xf32> to vector<8x378xf32>
    %293 = vector.shape_cast %290 : vector<8x378xf32> to vector<1x8x378xf32>
    tpu.vector_store %arg3[%c0_299, %c0_300, %c0_301], %293 {strides = array<i32>} : memref<1x8x378xf32, #tpu.memory_space<vmem>>, vector<1x8x378xf32>,
    return
  }
  func.func @transform_0(%arg0: i32) -> (i32, i32, i32) {
    %c0_i32 = arith.constant 0 : i32
    %c0_i32_0 = arith.constant 0 : i32
    %c0_i32_1 = arith.constant 0 : i32
    return %arg0, %c0_i32, %c0_i32_0 : i32, i32, i32
  }
  func.func @transform_1(%arg0: i32) -> (i32, i32, i32) {
    %c0_i32 = arith.constant 0 : i32
    %c0_i32_0 = arith.constant 0 : i32
    %c0_i32_1 = arith.constant 0 : i32
    %c0_i32_2 = arith.constant 0 : i32
    return %c0_i32, %c0_i32_0, %c0_i32_1 : i32, i32, i32
  }
  func.func @transform_2(%arg0: i32) -> (i32, i32, i32) {
    %c0_i32 = arith.constant 0 : i32
    %c0_i32_0 = arith.constant 0 : i32
    %c0_i32_1 = arith.constant 0 : i32
    return %arg0, %c0_i32, %c0_i32_0 : i32, i32, i32
  }
}

</mosaic_0001>

<bundles_post_ra>
// kernel: residual_3d_forward.2
= control target key start
LH: loop header
LB: loop body
LE: loop exit
PB: predicated region body
PF: predicated region fallthrough
CT: control target
= control target key end

     0   :  { %s3228_s9 = smov 0   ;;  %s3695_s0 = inlined_call_operand.vmem [shape: f32[2,8,600], index: 0, kind: input, shape index: {}]   ;;  %s3696_s1 = inlined_call_operand.vmem [shape: f32[27,8,8], index: 1, kind: input, shape index: {}]   ;;  %s3697_s2 = inlined_call_operand.vmem [shape: f32[2,8,378], index: 2, kind: output, shape index: {}]  }
   0x1 LB: > { %s2782_s10 = sadd.s32 4294967295, %s3185_s9   ;;  %p2786_p0 = scmp.ge.s32.totalorder %s3185_s9, 1  ;;  %s3185_s9 = sphi %s3228_s9, %s12_s9  }
   0x2   : > { %p112_p1 = scmp.lt.s32.totalorder %s3185_s9, 3 }
   0x4   : > { %p113_p2 = pnand %p2786_p0, %p112_p1 }
   0x5   : > { %p134_p3 = scmp.lt.s32.totalorder (!%p113_p2), %s2782_s10, 1  ;;  %s3187_s15 = smov (!%p113_p2), 126  }
   0x6   : > { %116 = sbr.rel (%p113_p2) target bundleno = 524 (0x20c), region = 28  ;;  %s3188_s16 = smov (!%p113_p2), 127  }
   0x7   : > { %s3189_s17 = smov (!%p113_p2), 118   ;;  %s3190_s18 = smov (!%p113_p2), 117  }
   0x8   : > { %s3191_s19 = smov (!%p113_p2), 116   ;;  %s3192_s20 = smov (!%p113_p2), 108  }
   0x9   : > { %s3193_s21 = smov (!%p113_p2), 107   ;;  %s3194_s22 = smov (!%p113_p2), 106  }
   0xa   : > { %s3195_s23 = smov (!%p113_p2), 28   ;;  %s3196_s24 = smov (!%p113_p2), 27  }
   0xb   : > { %s3699_s10 = smov (!%p134_p3, %s2782_s10), 1  ;;  %s3197_s25 = smov 26   ;;  %v147_v8 = vld [vmem:[%s3696_s1] sm:$0xff]  ;;  %vm148_vm0 = vcmask 64512   ;;  %vm418_vm1 = vcmask 965632   ;;  %vm230_vm2 = vcmask 1039360  }
   0xc   : > { %s2898_s11 = smul.u32 40, %s3699_s10  ;;  %s3198_s26 = smov 18   ;;  %vm322_vm3 = vcmask 1031168   ;;  %v2792_v23 = vld [vmem:[%s3696_s1 + $0x8] sm:$0xff]  ;;  %v2796_v27 = vld [vmem:[%s3696_s1 + $0x10] sm:$0xff]  ;;  %vm612_vm4 = vcmask 949248  }
   0xd   : > { %s3199_s27 = smov 17   ;;  %s3200_s28 = smov 16   ;;  %v2800_v39 = vld [vmem:[%s3696_s1 + $0x18] sm:$0xff]  ;;  %vm515_vm5 = vcmask 957440   ;;  %v2804_v51 = vld [vmem:[%s3696_s1 + $0x20] sm:$0xff]  ;;  %vm709_vm6 = vcmask 883712  }
   0xe   : > { %s3242_s14 = scalar_lea.vmem %s3695_s0, %s2898_s11  ;;  %s3201_s29 = smov 8   ;;  %v2808_v63 = vld [vmem:[%s3696_s1 + $0x28] sm:$0xff]  ;;  %vm806_vm7 = vcmask 875520   ;;  %vm903_vm8 = vcmask 867328   ;;  %vm1000_vm9 = vcmask 228352   ;;  %vm1097_vm10 = vcmask 220160  }
   0xf   : > { %v308_v0 = vld [vmem:[%s3242_s14] sm:$0xff]  ;;  %v3246_v1 = vld [vmem:[%s3242_s14 + $0x8] sm:$0xff]  ;;  %v310_v2 = vld [vmem:[%s3242_s14 + $0x10] sm:$0xff]  ;;  %s3202_s4 = smov 7   ;;  %s3203_s5 = smov 6   ;;  %vm1194_vm11 = vcmask 211968  }
  0x10   : > { %v2939_v3 = vpack.i.bf16 %v3246_v1, %v308_v0  ;;  %v3251_v4 = vpack.i.bf16 %v310_v2, %v3246_v1  ;;  %207 = vmatpush.msra.mxu2 %v310_v2  ;;  %187 = vmatpush.msra.mxu1 %v3246_v1  ;;  %v3256_v5 = vld [vmem:[%s3242_s14 + $0x18] sm:$0xff]  ;;  %s3204_s6 = smov 56   ;;  %v3284_v9 = vld [vmem:[%s3242_s14 + $0x20] sm:$0xff]  ;;  %s3205_s7 = smov 55   ;;  %v2630_v61 = vld [vmem:[%s3242_s14 + $0x8] sm:$0xff]  ;;  %vm1291_vm12 = vcmask 146432  }
  0x11   : > { %167 = vmatpush.msra.mxu0 %v308_v0  ;;  %v2949_v6 = vpack.i.bf16 %v308_v0, %v3256_v5  ;;  %v3260_v7 = vpack.i.bf16 %v3256_v5, %v310_v2  ;;  %2791 = vmatmul.msk.f32.vlgmr.msra.gmra.mxu2 %vm148_vm0, %v147_v8  ;;  %v3109_v11 = vpack.i.bf16 %v3246_v1, %v3284_v9  ;;  %s3206_s8 = smov 54   ;;  %s3207_s11 = smov 46   ;;  %v2631_v62 = vld [vmem:[%s3242_s14 + $0x10] sm:$0xff]  ;;  %vm1485_vm13 = vcmask 130048  }
  0x12   : > { %2940 = vrot.lane.b32.xlu1 %v2939_v3, %s3187_s15  ;;  %2935 = vrot.lane.b32.xlu0 %v2939_v3, %s3188_s16  ;;  %v3291_v12 = vpack.i.bf16 %v3284_v9, %v3256_v5  ;;  %s3208_s12 = smov 45   ;;  %vm1388_vm14 = vcmask 138240   ;;  %vm1678_vm15 = vcmask 56320  }
  0x13   : > { %2945 = vrot.lane.b32.xlu2 %v3251_v4, %s3189_s17  ;;  %2789 = vmatmul.msk.f32.vlgmr.msra.gmra.mxu0 %vm148_vm0, %v147_v8 }
  0x14   : > { %2790 = vmatmul.msk.f32.vlgmr.msra.gmra.mxu1 %vm148_vm0, %v147_v8 }
  0x1a   : > { %320 = vrot.lane.b32.xlu1 %v310_v2, %s3187_s15  ;;  %228 = vrot.lane.b32.xlu0 %v310_v2, %s3188_s16 }
  0x1b   : > { %2950 = vrot.lane.b32.xlu2 %v2949_v6, %s3189_s17 }
  0x22   : > { %2960 = vrot.lane.b32.xlu1 %v2939_v3, %s3190_s18  ;;  %2955 = vrot.lane.b32.xlu0 %v3260_v7, %s3190_s18  ;;  %s3209_s18 = smov 44  }
  0x23   : > { %2965 = vrot.lane.b32.xlu2 %v2939_v3, %s3191_s19 }
  0x2a   : > { %2970 = vrot.lane.b32.xlu0 %v3260_v7, %s3191_s19  ;;  %2975 = vrot.lane.b32.xlu1 %v2939_v3, %s3192_s20  ;;  %s3210_s19 = smov 36  }
  0x2b   : > { %2980 = vrot.lane.b32.xlu2 %v3260_v7, %s3192_s20 }
  0x32   : > { %2990 = vrot.lane.b32.xlu1 %v2949_v6, %s3193_s21  ;;  %2985 = vrot.lane.b32.xlu0 %v3251_v4, %s3193_s21 }
  0x33   : > { %2995 = vrot.lane.b32.xlu2 %v3260_v7, %s3194_s22 }
  0x3a   : > { %3000 = vrot.lane.b32.xlu0 %v2939_v3, %s3194_s22  ;;  %3005 = vrot.lane.b32.xlu1 %v2939_v3, %s3195_s23  ;;  %s3211_s22 = smov 35  }
  0x3b   : > { %3010 = vrot.lane.b32.xlu2 %v3260_v7, %s3195_s23 }
  0x42   : > { %3020 = vrot.lane.b32.xlu1 %v3260_v7, %s3196_s24  ;;  %3015 = vrot.lane.b32.xlu0 %v2939_v3, %s3196_s24 }
  0x43   : > { %3025 = vrot.lane.b32.xlu2 %v3251_v4, %s3197_s25 }
  0x4a   : > { %3030 = vrot.lane.b32.xlu0 %v2949_v6, %s3197_s25  ;;  %3035 = vrot.lane.b32.xlu1 %v3260_v7, %s3198_s26  ;;  %s3212_s25 = smov 34  }
  0x4b   : > { %3040 = vrot.lane.b32.xlu2 %v2939_v3, %s3198_s26 }
  0x52   : > { %3050 = vrot.lane.b32.xlu1 %v3260_v7, %s3199_s27  ;;  %3045 = vrot.lane.b32.xlu0 %v2939_v3, %s3199_s27 }
  0x53   : > { %3055 = vrot.lane.b32.xlu2 %v2939_v3, %s3200_s28 }
  0x5a   : > { %3060 = vrot.lane.b32.xlu0 %v3260_v7, %s3200_s28  ;;  %3065 = vrot.lane.b32.xlu1 %v3251_v4, %s3201_s29 }
  0x5b   : > { %3070 = vrot.lane.b32.xlu2 %v2949_v6, %s3201_s29  ;;  %v2812_v6 = vld [vmem:[%s3696_s1 + $0x30] sm:$0xff] }
  0x62   : > { %3080 = vrot.lane.b32.xlu1 %v2939_v3, %s3202_s4  ;;  %3075 = vrot.lane.b32.xlu0 %v3260_v7, %s3202_s4 }
  0x63   : > { %3085 = vrot.lane.b32.xlu2 %v2939_v3, %s3203_s5 }
  0x6a   : > { %3090 = vrot.lane.b32.xlu0 %v3260_v7, %s3203_s5  ;;  %3095 = vrot.lane.b32.xlu1 %v3251_v4, %s3204_s6 }
  0x6b   : > { %3100 = vrot.lane.b32.xlu2 %v3291_v12, %s3204_s6 }
  0x6d   : > { %v2946_v10 = vpop.permute.xlu2 %2945 }
  0x6e   : > { %v2948_v15 = vunpack.i.h.bf16 %v2946_v10  ;;  %v2947_v16 = vunpack.i.l.bf16 %v2946_v10 }
  0x70   : > { %v420_v24 = vsel %vm418_vm1, %v2947_v16, %v2948_v15 }
  0x72   : > { %3110 = vrot.lane.b32.xlu1 %v3109_v11, %s3205_s7  ;;  %3105 = vrot.lane.b32.xlu0 %v3260_v7, %s3205_s7 }
  0x73   : > { %3115 = vrot.lane.b32.xlu2 %v3291_v12, %s3206_s8 }
  0x75   : > { %v2951_v13 = vpop.permute.xlu2 %2950 }
  0x76   : > { %v2953_v28 = vunpack.i.h.bf16 %v2951_v13  ;;  %v2952_v29 = vunpack.i.l.bf16 %v2951_v13 }
  0x78   : > { %v419_v35 = vsel %vm418_vm1, %v2953_v28, %v2947_v16  ;;  %v421_v38 = vsel %vm418_vm1, %v2948_v15, %v2952_v29  ;;  %vm1775_vm1 = vcmask 48128  }
  0x7a   : > { %3120 = vrot.lane.b32.xlu0 %v3251_v4, %s3206_s8  ;;  %3125 = vrot.lane.b32.xlu1 %v3251_v4, %s3207_s11 }
  0x7b   : > { %3130 = vrot.lane.b32.xlu2 %v3291_v12, %s3207_s11 }
  0x7d   : > { %v3297_v14 = vpop.permute.xlu2 %2965 }
  0x7e   : > { %v2968_v31 = vunpack.i.h.bf16 %v3297_v14  ;;  %v2967_v32 = vunpack.i.l.bf16 %v3297_v14 }
  0x80   : > { %v613_v40 = vsel %vm612_vm4, %v2967_v32, %v2968_v31 }
  0x82   : > { %3140 = vrot.lane.b32.xlu1 %v3291_v12, %s3208_s12  ;;  %3135 = vrot.lane.b32.xlu0 %v3251_v4, %s3208_s12 }
  0x83   : > { %3145 = vrot.lane.b32.xlu2 %v3260_v7, %s3209_s18 }
  0x84   : > { %v2941_v17 = vpop.permute.xlu1 %2940  ;;  %v2936_v18 = vpop.permute.xlu0 %2935 }
  0x85   : > { %v2943_v19 = vunpack.i.h.bf16 %v2941_v17  ;;  %v2942_v20 = vunpack.i.l.bf16 %v2941_v17  ;;  %v2938_v21 = vunpack.i.h.bf16 %v2936_v18  ;;  %v2937_v22 = vunpack.i.l.bf16 %v2936_v18  ;;  %v3312_v30 = vpop.permute.xlu2 %2980 }
  0x86   : > { %v2983_v54 = vunpack.i.h.bf16 %v3312_v30  ;;  %v2982_v55 = vunpack.i.l.bf16 %v3312_v30 }
  0x87   : > { %v231_v25 = vsel %vm230_vm2, %v2937_v22, %v2938_v21  ;;  %v323_v26 = vsel %vm322_vm3, %v2942_v20, %v2943_v19  ;;  %v2816_v20 = vld [vmem:[%s3696_s1 + $0x38] sm:$0xff] }
  0x88   : > { %254 = vmatpush.msra.mxu3 %v231_v25  ;;  %346 = vmatpush.msrb.mxu2 %v323_v26 }
  0x89   : > { %2793 = vmatmul.msk.f32.vlgmr.msra.gmra.mxu3 %vm148_vm0, %v2792_v23  ;;  %2797 = vmatmul.msk.f32.vlgmr.msrb.gmra.mxu2 %vm148_vm0, %v2796_v27 }
  0x8a   : > { %463 = vmatpush.msra.mxu2 %v420_v24  ;;  %3150 = vrot.lane.b32.xlu0 %v3109_v11, %s3209_s18 }
  0x8b   : > { %3155 = vrot.lane.b32.xlu1 %v3291_v12, %s3210_s19  ;;  %3160 = vrot.lane.b32.xlu2 %v3251_v4, %s3210_s19 }
  0x8c   : > { %v321_v33 = vpop.permute.xlu1 %320  ;;  %v229_v34 = vpop.permute.xlu0 %228 }
  0x8d   : > { %294 = vmatpush.msrb.mxu1 %v229_v34  ;;  %v232_v36 = vsel %vm230_vm2, %v2938_v21, %v229_v34  ;;  %v324_v37 = vsel %vm322_vm3, %v2943_v19, %v321_v33  ;;  %v3333_v41 = vpop.permute.xlu2 %2995  ;;  %vm1872_vm2 = vcmask 457728   ;;  %vm214_vm3 = vcmask 998400  }
  0x8e   : > { %274 = vmatpush.msrb.mxu0 %v232_v36  ;;  %366 = vmatpush.msrb.mxu3 %v324_v37  ;;  %v2997_v10 = vunpack.i.l.bf16 %v3333_v41 }
  0x8f   : > { %443 = vmatpush.msra.mxu1 %v419_v35  ;;  %2794 = vmatmul.msk.f32.vlgmr.msrb.gmra.mxu0 %vm148_vm0, %v2792_v23  ;;  %v2820_v35 = vld [vmem:[%s3696_s1 + $0x40] sm:$0xff] }
  0x90   : > { %386 = vmatpush.msra.mxu0 %v321_v33  ;;  %483 = vmatpush.msra.mxu3 %v421_v38 }
  0x91   : > { %2795 = vmatmul.msk.f32.vlgmr.msrb.gmra.mxu1 %vm148_vm0, %v2792_v23  ;;  %2798 = vmatmul.msk.f32.vlgmr.msrb.gmra.mxu3 %vm148_vm0, %v2796_v27 }
  0x92   : > { %2802 = vmatmul.msk.f32.vlgmr.msra.gmra.mxu2 %vm148_vm0, %v2800_v39  ;;  %637 = vmatpush.msrb.mxu3 %v613_v40 }
  0x93   : > { %3170 = vrot.lane.b32.xlu1 %v3291_v12, %s3211_s22  ;;  %3165 = vrot.lane.b32.xlu0 %v3251_v4, %s3211_s22  ;;  %v712_v4 = vsel %vm709_vm6, %v2982_v55, %v2983_v54  ;;  %s2899_s22 = smul.u32 24, %s3699_s10 }
  0x94   : > { %v2961_v42 = vpop.permute.xlu1 %2960  ;;  %v2956_v43 = vpop.permute.xlu0 %2955 }
  0x95   : > { %v2963_v44 = vunpack.i.h.bf16 %v2961_v42  ;;  %v2962_v45 = vunpack.i.l.bf16 %v2961_v42  ;;  %v2958_v46 = vunpack.i.h.bf16 %v2956_v43  ;;  %v2957_v47 = vunpack.i.l.bf16 %v2956_v43  ;;  %v3347_v52 = vpop.permute.xlu2 %3010 }
  0x96   : > { %v3013_v22 = vunpack.i.h.bf16 %v3347_v52  ;;  %v3012_v23 = vunpack.i.l.bf16 %v3347_v52 }
  0x97   : > { %v517_v48 = vsel %vm515_vm5, %v2963_v44, %v2957_v47  ;;  %v518_v49 = vsel %vm515_vm5, %v2957_v47, %v2958_v46  ;;  %v516_v50 = vsel %vm515_vm5, %v2962_v45, %v2963_v44  ;;  %2799 = vmatmul.msk.f32.vlgmr.msra.gmra.mxu0 %vm148_vm0, %v2796_v27  ;;  %v2824_v44 = vld [vmem:[%s3696_s1 + $0x48] sm:$0xff]  ;;  %vm2066_vm5 = vcmask 441344  }
  0x98   : > { %560 = vmatpush.msrb.mxu1 %v517_v48  ;;  %580 = vmatpush.msrb.mxu2 %v518_v49  ;;  %v1003_v34 = vsel %vm1000_vm9, %v3012_v23, %v3013_v22  ;;  %v2828_v49 = vld [vmem:[%s3696_s1 + $0x50] sm:$0xff] }
  0x99   : > { %2803 = vmatmul.msk.f32.vlgmr.msra.gmra.mxu3 %vm148_vm0, %v2800_v39  ;;  %2801 = vmatmul.msk.f32.vlgmr.msra.gmra.mxu1 %vm148_vm0, %v2800_v39 }
  0x9a   : > { %540 = vmatpush.msrb.mxu0 %v516_v50  ;;  %2807 = vmatmul.msk.f32.vlgmr.msrb.gmra.mxu2 %vm148_vm0, %v2804_v51 }
  0x9b   : > { %2646 = vrot.lane.b32.xlu1 %v3284_v9, %s3212_s25  ;;  %2644 = vrot.lane.b32.xlu0 %v3256_v5, %s3212_s25  ;;  %v3174_v5 = vpack.i.bf16 %v2631_v62, %v2630_v61  ;;  %v2998_v9 = vunpack.i.h.bf16 %v3333_v41 }
  0x9c   : > { %v2971_v53 = vpop.permute.xlu0 %2970  ;;  %v2976_v56 = vpop.permute.xlu1 %2975 }
  0x9d   : > { %v2973_v57 = vunpack.i.h.bf16 %v2971_v53  ;;  %v2972_v58 = vunpack.i.l.bf16 %v2971_v53  ;;  %v2978_v59 = vunpack.i.h.bf16 %v2976_v56  ;;  %v2977_v60 = vunpack.i.l.bf16 %v2976_v56  ;;  %3175 = vrot.lane.b32.xlu2 %v3174_v5, %s3212_s25  ;;  %v3379_v15 = vpop.permute.xlu2 %3025  ;;  %s3474_s25 = scalar_lea.vmem %s3697_s2, %s2899_s22 }
  0x9e   : > { %v906_v19 = vsel %vm903_vm8, %v2997_v10, %v2998_v9  ;;  %v3028_v38 = vunpack.i.h.bf16 %v3379_v15  ;;  %v3027_v39 = vunpack.i.l.bf16 %v3379_v15 }
  0x9f   : > { %v614_v0 = vsel %vm612_vm4, %v2968_v31, %v2972_v58  ;;  %v615_v1 = vsel %vm612_vm4, %v2972_v58, %v2973_v57  ;;  %v710_v2 = vsel %vm709_vm6, %v2977_v60, %v2978_v59  ;;  %v711_v3 = vsel %vm709_vm6, %v2978_v59, %v2982_v55  ;;  %2805 = vmatmul.msk.f32.vlgmr.msrb.gmra.mxu0 %vm148_vm0, %v2804_v51 }
  0xa0   : > { %657 = vmatpush.msra.mxu0 %v614_v0  ;;  %677 = vmatpush.msra.mxu1 %v615_v1  ;;  %v1196_v48 = vsel %vm1194_vm11, %v3027_v39, %v3028_v38  ;;  %vm1969_vm4 = vcmask 449536   ;;  %vm2163_vm6 = vcmask 375808  }
  0xa1   : > { %2809 = vmatmul.msk.f32.vlgmr.msrb.gmra.mxu3 %vm148_vm0, %v2808_v63  ;;  %2806 = vmatmul.msk.f32.vlgmr.msrb.gmra.mxu1 %vm148_vm0, %v2804_v51 }
  0xa2   : > { %734 = vmatpush.msra.mxu2 %v710_v2  ;;  %754 = vmatpush.msra.mxu3 %v711_v3  ;;  %v2832_v2 = vld [vmem:[%s3696_s1 + $0x58] sm:$0xff] }
  0xa3   : > { %774 = vmatpush.msrb.mxu0 %v712_v4  ;;  %2813 = vmatmul.msk.f32.vlgmr.msra.gmra.mxu2 %vm148_vm0, %v2812_v6 }
  0xa4   : > { %v2991_v7 = vpop.permute.xlu1 %2990  ;;  %v2986_v8 = vpop.permute.xlu0 %2985 }
  0xa5   : > { %v2993_v11 = vunpack.i.h.bf16 %v2991_v7  ;;  %v2992_v12 = vunpack.i.l.bf16 %v2991_v7  ;;  %v2988_v13 = vunpack.i.h.bf16 %v2986_v8  ;;  %v2987_v14 = vunpack.i.l.bf16 %v2986_v8  ;;  %v3041_v32 = vpop.permute.xlu2 %3040 }
  0xa6   : > { %v3043_v52 = vunpack.i.h.bf16 %v3041_v32  ;;  %v3042_v53 = vunpack.i.l.bf16 %v3041_v32 }
  0xa7   : > { %v807_v16 = vsel %vm806_vm7, %v2993_v11, %v2987_v14  ;;  %v808_v17 = vsel %vm806_vm7, %v2987_v14, %v2988_v13  ;;  %v809_v18 = vsel %vm806_vm7, %v2988_v13, %v2992_v12  ;;  %2810 = vmatmul.msk.f32.vlgmr.msra.gmra.mxu0 %vm148_vm0, %v2808_v63  ;;  %v2836_v14 = vld [vmem:[%s3696_s1 + $0x60] sm:$0xff]  ;;  %vm2260_vm7 = vcmask 367616  }
  0xa8   : > { %831 = vmatpush.msrb.mxu1 %v807_v16  ;;  %851 = vmatpush.msrb.mxu2 %v808_v17  ;;  %v1292_v1 = vsel %vm1291_vm12, %v3042_v53, %v3043_v52 }
  0xa9   : > { %2814 = vmatmul.msk.f32.vlgmr.msra.gmra.mxu3 %vm148_vm0, %v2812_v6  ;;  %2811 = vmatmul.msk.f32.vlgmr.msra.gmra.mxu1 %vm148_vm0, %v2808_v63 }
  0xaa   : > { %871 = vmatpush.msrb.mxu3 %v809_v18  ;;  %968 = vmatpush.msra.mxu2 %v906_v19 }
  0xab   : > { %2818 = vmatmul.msk.f32.vlgmr.msrb.gmra.mxu2 %vm148_vm0, %v2816_v20 }
  0xac   : > { %v3001_v21 = vpop.permute.xlu0 %3000  ;;  %v3006_v24 = vpop.permute.xlu1 %3005 }
  0xad   : > { %v3003_v25 = vunpack.i.h.bf16 %v3001_v21  ;;  %v3002_v26 = vunpack.i.l.bf16 %v3001_v21  ;;  %v3008_v27 = vunpack.i.h.bf16 %v3006_v24  ;;  %v3007_v28 = vunpack.i.l.bf16 %v3006_v24  ;;  %v3411_v50 = vpop.permute.xlu2 %3055  ;;  %v2840_v24 = vld [vmem:[%s3696_s1 + $0x68] sm:$0xff] }
  0xae   : > { %v3058_v59 = vunpack.i.h.bf16 %v3411_v50  ;;  %v3057_v60 = vunpack.i.l.bf16 %v3411_v50 }
  0xaf   : > { %v905_v29 = vsel %vm903_vm8, %v3003_v25, %v2997_v10  ;;  %v904_v30 = vsel %vm903_vm8, %v3002_v26, %v3003_v25  ;;  %v1001_v31 = vsel %vm1000_vm9, %v3007_v28, %v3008_v27  ;;  %v1002_v33 = vsel %vm1000_vm9, %v3008_v27, %v3012_v23  ;;  %2815 = vmatmul.msk.f32.vlgmr.msrb.gmra.mxu0 %vm148_vm0, %v2812_v6 }
  0xb0   : > { %948 = vmatpush.msra.mxu1 %v905_v29  ;;  %928 = vmatpush.msra.mxu0 %v904_v30  ;;  %v1486_v4 = vsel %vm1485_vm13, %v3057_v60, %v3058_v59  ;;  %v2844_v30 = vld [vmem:[%s3696_s1 + $0x70] sm:$0xff]  ;;  %vm2357_vm8 = vcmask 359424   ;;  %vm2454_vm9 = vcmask 293888  }
  0xb1   : > { %2819 = vmatmul.msk.f32.vlgmr.msrb.gmra.mxu3 %vm148_vm0, %v2816_v20  ;;  %2817 = vmatmul.msk.f32.vlgmr.msrb.gmra.mxu1 %vm148_vm0, %v2816_v20 }
  0xb2   : > { %1025 = vmatpush.msra.mxu3 %v1001_v31  ;;  %1045 = vmatpush.msrb.mxu0 %v1002_v33 }
  0xb3   : > { %1065 = vmatpush.msrb.mxu1 %v1003_v34  ;;  %2823 = vmatmul.msk.f32.vlgmr.msra.gmra.mxu2 %vm148_vm0, %v2820_v35 }
  0xb4   : > { %v3021_v36 = vpop.permute.xlu1 %3020  ;;  %v3016_v37 = vpop.permute.xlu0 %3015 }
  0xb5   : > { %v3023_v40 = vunpack.i.h.bf16 %v3021_v36  ;;  %v3022_v41 = vunpack.i.l.bf16 %v3021_v36  ;;  %v3018_v42 = vunpack.i.h.bf16 %v3016_v37  ;;  %v3017_v43 = vunpack.i.l.bf16 %v3016_v37  ;;  %v3071_v3 = vpop.permute.xlu2 %3070 }
  0xb6   : > { %v3073_v17 = vunpack.i.h.bf16 %v3071_v3  ;;  %v3072_v18 = vunpack.i.l.bf16 %v3071_v3  ;;  %v2856_v3 = vld [vmem:[%s3696_s1 + $0x88] sm:$0xff] }
  0xb7   : > { %v1098_v45 = vsel %vm1097_vm10, %v3017_v43, %v3018_v42  ;;  %v1099_v46 = vsel %vm1097_vm10, %v3018_v42, %v3022_v41  ;;  %v1100_v47 = vsel %vm1097_vm10, %v3022_v41, %v3023_v40  ;;  %2821 = vmatmul.msk.f32.vlgmr.msra.gmra.mxu0 %vm148_vm0, %v2820_v35  ;;  %vm2551_vm10 = vcmask 285696  }
  0xb8   : > { %1122 = vmatpush.msrb.mxu2 %v1098_v45  ;;  %1142 = vmatpush.msrb.mxu3 %v1099_v46 }
  0xb9   : > { %2825 = vmatmul.msk.f32.vlgmr.msra.gmra.mxu3 %vm148_vm0, %v2824_v44  ;;  %2822 = vmatmul.msk.f32.vlgmr.msra.gmra.mxu1 %vm148_vm0, %v2820_v35 }
  0xba   : > { %1162 = vmatpush.msra.mxu0 %v1100_v47  ;;  %1239 = vmatpush.msra.mxu2 %v1196_v48 }
  0xbb   : > { %2829 = vmatmul.msk.f32.vlgmr.msrb.gmra.mxu2 %vm148_vm0, %v2828_v49 }
  0xbc   : > { %v3031_v51 = vpop.permute.xlu0 %3030  ;;  %v3036_v54 = vpop.permute.xlu1 %3035 }
  0xbd   : > { %v3033_v55 = vunpack.i.h.bf16 %v3031_v51  ;;  %v3032_v56 = vunpack.i.l.bf16 %v3031_v51  ;;  %v3038_v57 = vunpack.i.h.bf16 %v3036_v54  ;;  %v3037_v58 = vunpack.i.l.bf16 %v3036_v54  ;;  %v3432_v15 = vpop.permute.xlu2 %3085 }
  0xbe   : > { %v3088_v34 = vunpack.i.h.bf16 %v3432_v15  ;;  %v3087_v35 = vunpack.i.l.bf16 %v3432_v15 }
  0xbf   : > { %v1195_v61 = vsel %vm1194_vm11, %v3033_v55, %v3027_v39  ;;  %v1197_v62 = vsel %vm1194_vm11, %v3028_v38, %v3032_v56  ;;  %v1294_v63 = vsel %vm1291_vm12, %v3037_v58, %v3038_v57  ;;  %v1293_v0 = vsel %vm1291_vm12, %v3043_v52, %v3037_v58  ;;  %2826 = vmatmul.msk.f32.vlgmr.msrb.gmra.mxu0 %vm148_vm0, %v2824_v44  ;;  %v2852_v57 = vld [vmem:[%s3696_s1 + $0x80] sm:$0xff]  ;;  %v209_v58 = vpop.f32.mrf.mxu2 }
  0xc0   : > { %1219 = vmatpush.msra.mxu1 %v1195_v61  ;;  %1259 = vmatpush.msra.mxu3 %v1197_v62  ;;  %v1776_v43 = vsel %vm1775_vm1, %v3087_v35, %v3088_v34  ;;  %215 = vst.msk [vmem:[%s3474_s25 + $0x10] sm:$0xff] %vm214_vm3, %v209_v58  ;;  %vm2648_vm11 = vcmask 277504  }
  0xc1   : > { %2830 = vmatmul.msk.f32.vlgmr.msrb.gmra.mxu3 %vm148_vm0, %v2828_v49  ;;  %2827 = vmatmul.msk.f32.vlgmr.msrb.gmra.mxu1 %vm148_vm0, %v2824_v44  ;;  %v2848_v44 = vld [vmem:[%s3696_s1 + $0x78] sm:$0xff] }
  0xc2   : > { %1356 = vmatpush.msrb.mxu2 %v1294_v63  ;;  %1336 = vmatpush.msrb.mxu1 %v1293_v0 }
  0xc3   : > { %1316 = vmatpush.msrb.mxu0 %v1292_v1  ;;  %2834 = vmatmul.msk.f32.vlgmr.msra.gmra.mxu2 %vm148_vm0, %v2832_v2 }
  0xc4   : > { %v3051_v5 = vpop.permute.xlu1 %3050  ;;  %v3046_v6 = vpop.permute.xlu0 %3045  ;;  %1510 = vmatpush.msra.mxu2 %v1486_v4 }
  0xc5   : > { %v3053_v7 = vunpack.i.h.bf16 %v3051_v5  ;;  %v3052_v8 = vunpack.i.l.bf16 %v3051_v5  ;;  %v3048_v9 = vunpack.i.h.bf16 %v3046_v6  ;;  %v3047_v10 = vunpack.i.l.bf16 %v3046_v6  ;;  %v3450_v31 = vpop.permute.xlu2 %3100 }
  0xc6   : > { %v3102_v47 = vunpack.i.l.bf16 %v3450_v31 }
  0xc7   : > { %v1389_v11 = vsel %vm1388_vm14, %v3047_v10, %v3048_v9  ;;  %v1390_v12 = vsel %vm1388_vm14, %v3048_v9, %v3052_v8  ;;  %v1391_v13 = vsel %vm1388_vm14, %v3052_v8, %v3053_v7  ;;  %2831 = vmatmul.msk.f32.vlgmr.msra.gmra.mxu0 %vm148_vm0, %v2828_v49  ;;  %v2860_v10 = vld [vmem:[%s3696_s1 + $0x90] sm:$0xff] }
  0xc8   : > { %1413 = vmatpush.msrb.mxu3 %v1389_v11  ;;  %1433 = vmatpush.msra.mxu0 %v1390_v12 }
  0xc9   : > { %2835 = vmatmul.msk.f32.vlgmr.msra.gmra.mxu3 %vm148_vm0, %v2832_v2  ;;  %2833 = vmatmul.msk.f32.vlgmr.msra.gmra.mxu1 %vm148_vm0, %v2832_v2 }
  0xca   : > { %1453 = vmatpush.msra.mxu1 %v1391_v13 }
  0xcb   : > { %2839 = vmatmul.msk.f32.vlgmr.msrb.gmra.mxu2 %vm148_vm0, %v2836_v14 }
  0xcc   : > { %v3061_v16 = vpop.permute.xlu0 %3060  ;;  %v3066_v19 = vpop.permute.xlu1 %3065 }
  0xcd   : > { %v3063_v20 = vunpack.i.h.bf16 %v3061_v16  ;;  %v3062_v21 = vunpack.i.l.bf16 %v3061_v16  ;;  %v3068_v22 = vunpack.i.h.bf16 %v3066_v19  ;;  %v3067_v23 = vunpack.i.l.bf16 %v3066_v19  ;;  %v3462_v45 = vpop.permute.xlu2 %3115 }
  0xce   : > { %v3118_v4 = vunpack.i.h.bf16 %v3462_v45  ;;  %v3117_v5 = vunpack.i.l.bf16 %v3462_v45 }
  0xcf   : > { %v1487_v25 = vsel %vm1485_vm13, %v3058_v59, %v3062_v21  ;;  %v1488_v26 = vsel %vm1485_vm13, %v3062_v21, %v3063_v20  ;;  %v1583_v27 = vsel %vm148_vm0, %v3067_v23, %v3068_v22  ;;  %v1582_v28 = vsel %vm148_vm0, %v3073_v17, %v3067_v23  ;;  %2837 = vmatmul.msk.f32.vlgmr.msrb.gmra.mxu0 %vm148_vm0, %v2836_v14 }
  0xd0   : > { %1530 = vmatpush.msra.mxu3 %v1487_v25  ;;  %1626 = vmatpush.msrb.mxu2 %v1583_v27  ;;  %v1584_v29 = vsel %vm148_vm0, %v3068_v22, %v3072_v18  ;;  %v3103_v59 = vunpack.i.h.bf16 %v3450_v31  ;;  %v2069_v11 = vsel %vm2066_vm5, %v3117_v5, %v3118_v4  ;;  %v2864_v22 = vld [vmem:[%s3696_s1 + $0x98] sm:$0xff] }
  0xd1   : > { %2841 = vmatmul.msk.f32.vlgmr.msrb.gmra.mxu3 %vm148_vm0, %v2840_v24  ;;  %2838 = vmatmul.msk.f32.vlgmr.msrb.gmra.mxu1 %vm148_vm0, %v2836_v14 }
  0xd2   : > { %1550 = vmatpush.msrb.mxu0 %v1488_v26  ;;  %1606 = vmatpush.msrb.mxu1 %v1582_v28  ;;  %v1875_v6 = vsel %vm1872_vm2, %v3102_v47, %v3103_v59 }
  0xd3   : > { %1646 = vmatpush.msrb.mxu3 %v1584_v29  ;;  %2845 = vmatmul.msk.f32.vlgmr.msra.gmra.mxu2 %vm148_vm0, %v2844_v30 }
  0xd4   : > { %v3081_v32 = vpop.permute.xlu1 %3080  ;;  %v3076_v33 = vpop.permute.xlu0 %3075 }
  0xd5   : > { %v3083_v36 = vunpack.i.h.bf16 %v3081_v32  ;;  %v3082_v37 = vunpack.i.l.bf16 %v3081_v32  ;;  %v3078_v38 = vunpack.i.h.bf16 %v3076_v33  ;;  %v3077_v39 = vunpack.i.l.bf16 %v3076_v33  ;;  %v3131_v2 = vpop.permute.xlu2 %3130 }
  0xd6   : > { %v3132_v23 = vunpack.i.l.bf16 %v3131_v2 }
  0xd7   : > { %v1681_v40 = vsel %vm1678_vm15, %v3077_v39, %v3078_v38  ;;  %v1679_v41 = vsel %vm1678_vm15, %v3082_v37, %v3083_v36  ;;  %v1680_v42 = vsel %vm1678_vm15, %v3083_v36, %v3077_v39  ;;  %2842 = vmatmul.msk.f32.vlgmr.msra.gmra.mxu0 %vm148_vm0, %v2840_v24  ;;  %v2868_v36 = vld [vmem:[%s3696_s1 + $0xa0] sm:$0xff] }
  0xd8   : > { %1743 = vmatpush.msra.mxu2 %v1681_v40  ;;  %1703 = vmatpush.msra.mxu0 %v1679_v41 }
  0xd9   : > { %2846 = vmatmul.msk.f32.vlgmr.msra.gmra.mxu3 %vm148_vm0, %v2844_v30  ;;  %2843 = vmatmul.msk.f32.vlgmr.msra.gmra.mxu1 %vm148_vm0, %v2840_v24  ;;  %v3133_v24 = vunpack.i.h.bf16 %v3131_v2  ;;  %v2880_v2 = vld [vmem:[%s3696_s1 + $0xb8] sm:$0xff] }
  0xda   : > { %1723 = vmatpush.msra.mxu1 %v1680_v42  ;;  %1800 = vmatpush.msra.mxu3 %v1776_v43 }
  0xdb   : > { %2850 = vmatmul.msk.f32.vlgmr.msrb.gmra.mxu2 %vm148_vm0, %v2848_v44 }
  0xdc   : > { %v3091_v46 = vpop.permute.xlu0 %3090  ;;  %v3096_v48 = vpop.permute.xlu1 %3095 }
  0xdd   : > { %v3093_v49 = vunpack.i.h.bf16 %v3091_v46  ;;  %v3092_v50 = vunpack.i.l.bf16 %v3091_v46  ;;  %v3098_v51 = vunpack.i.h.bf16 %v3096_v48  ;;  %v3097_v52 = vunpack.i.l.bf16 %v3096_v48  ;;  %v3146_v19 = vpop.permute.xlu2 %3145 }
  0xde   : > { %v3147_v31 = vunpack.i.l.bf16 %v3146_v19 }
  0xdf   : > { %v1777_v53 = vsel %vm1775_vm1, %v3088_v34, %v3092_v50  ;;  %v1873_v54 = vsel %vm1872_vm2, %v3097_v52, %v3098_v51  ;;  %v1778_v55 = vsel %vm1775_vm1, %v3092_v50, %v3093_v49  ;;  %v1874_v56 = vsel %vm1872_vm2, %v3098_v51, %v3102_v47  ;;  %2847 = vmatmul.msk.f32.vlgmr.msrb.gmra.mxu0 %vm148_vm0, %v2844_v30  ;;  %v2876_v50 = vld [vmem:[%s3696_s1 + $0xb0] sm:$0xff]  ;;  %v169_v52 = vpop.f32.mrf.mxu0 }
  0xe0   : > { %1897 = vmatpush.msrb.mxu2 %v1873_v54  ;;  %1820 = vmatpush.msrb.mxu0 %v1777_v53  ;;  %v3148_v30 = vunpack.i.h.bf16 %v3146_v19  ;;  %v2166_v34 = vsel %vm2163_vm6, %v3132_v23, %v3133_v24 }
  0xe1   : > { %2851 = vmatmul.msk.f32.vlgmr.msrb.gmra.mxu3 %vm148_vm0, %v2848_v44  ;;  %2849 = vmatmul.msk.f32.vlgmr.msrb.gmra.mxu1 %vm148_vm0, %v2848_v44  ;;  %v2872_v44 = vld [vmem:[%s3696_s1 + $0xa8] sm:$0xff] }
  0xe2   : > { %1840 = vmatpush.msrb.mxu1 %v1778_v55  ;;  %1917 = vmatpush.msrb.mxu3 %v1874_v56  ;;  %v2359_v38 = vsel %vm2357_vm8, %v3147_v31, %v3148_v30  ;;  %v189_v56 = vpop.f32.mrf.mxu1 }
  0xe3   : > { %2855 = vmatmul.msk.f32.vlgmr.msra.gmra.mxu2 %vm148_vm0, %v2852_v57 }
  0xe4   : > { %v3111_v60 = vpop.permute.xlu1 %3110  ;;  %v3106_v61 = vpop.permute.xlu0 %3105 }
  0xe5   : > { %v3113_v62 = vunpack.i.h.bf16 %v3111_v60  ;;  %v3112_v63 = vunpack.i.l.bf16 %v3111_v60  ;;  %v3108_v0 = vunpack.i.h.bf16 %v3106_v61  ;;  %v3107_v1 = vunpack.i.l.bf16 %v3106_v61  ;;  %v3161_v37 = vpop.permute.xlu2 %3160 }
  0xe6   : > { %v3163_v53 = vunpack.i.h.bf16 %v3161_v37  ;;  %v3162_v54 = vunpack.i.l.bf16 %v3161_v37 }
  0xe7   : > { %v1971_v7 = vsel %vm1969_vm4, %v3107_v1, %v3108_v0  ;;  %v1970_v8 = vsel %vm1969_vm4, %v3113_v62, %v3107_v1  ;;  %v1972_v9 = vsel %vm1969_vm4, %v3108_v0, %v3112_v63  ;;  %2853 = vmatmul.msk.f32.vlgmr.msra.gmra.mxu0 %vm148_vm0, %v2852_v57 }
  0xe8   : > { %2014 = vmatpush.msra.mxu2 %v1971_v7  ;;  %1937 = vmatpush.msra.mxu0 %v1875_v6  ;;  %v2455_v62 = vsel %vm2454_vm9, %v3162_v54, %v3163_v53  ;;  %v301_v6 = vld [vmem:[%s3474_s25 + $0x10] sm:$0xff] }
  0xe9   : > { %2857 = vmatmul.msk.f32.vlgmr.msra.gmra.mxu3 %vm148_vm0, %v2856_v3  ;;  %2854 = vmatmul.msk.f32.vlgmr.msra.gmra.mxu1 %vm148_vm0, %v2852_v57 }
  0xea   : > { %1994 = vmatpush.msra.mxu1 %v1970_v8  ;;  %2034 = vmatpush.msra.mxu3 %v1972_v9 }
  0xeb   : > { %2861 = vmatmul.msk.f32.vlgmr.msrb.gmra.mxu2 %vm148_vm0, %v2860_v10 }
  0xec   : > { %v3121_v12 = vpop.permute.xlu0 %3120  ;;  %v3126_v13 = vpop.permute.xlu1 %3125  ;;  %2131 = vmatpush.msrb.mxu2 %v2069_v11 }
  0xed   : > { %v3123_v14 = vunpack.i.h.bf16 %v3121_v12  ;;  %v3122_v15 = vunpack.i.l.bf16 %v3121_v12  ;;  %v3128_v16 = vunpack.i.h.bf16 %v3126_v13  ;;  %v3127_v17 = vunpack.i.l.bf16 %v3126_v13 }
  0xef   : > { %v2067_v18 = vsel %vm2066_vm5, %v3122_v15, %v3123_v14  ;;  %v2068_v20 = vsel %vm2066_vm5, %v3123_v14, %v3117_v5  ;;  %v2164_v21 = vsel %vm2163_vm6, %v3127_v17, %v3128_v16  ;;  %2858 = vmatmul.msk.f32.vlgmr.msrb.gmra.mxu0 %vm148_vm0, %v2856_v3  ;;  %v2165_v32 = vsel %vm2163_vm6, %v3128_v16, %v3132_v23  ;;  %v2884_v17 = vld [vmem:[%s3696_s1 + $0xc0] sm:$0xff] }
  0xf0   : > { %2091 = vmatpush.msrb.mxu0 %v2067_v18 }
  0xf1   : > { %2862 = vmatmul.msk.f32.vlgmr.msrb.gmra.mxu3 %vm148_vm0, %v2860_v10  ;;  %2859 = vmatmul.msk.f32.vlgmr.msrb.gmra.mxu1 %vm148_vm0, %v2856_v3 }
  0xf2   : > { %2111 = vmatpush.msrb.mxu1 %v2068_v20  ;;  %2188 = vmatpush.msrb.mxu3 %v2164_v21 }
  0xf3   : > { %2866 = vmatmul.msk.f32.vlgmr.msra.gmra.mxu2 %vm148_vm0, %v2864_v22 }
  0xf4   : > { %v3141_v25 = vpop.permute.xlu1 %3140  ;;  %v3136_v26 = vpop.permute.xlu0 %3135 }
  0xf5   : > { %v3142_v27 = vunpack.i.l.bf16 %v3141_v25  ;;  %v3138_v28 = vunpack.i.h.bf16 %v3136_v26  ;;  %v3137_v29 = vunpack.i.l.bf16 %v3136_v26  ;;  %v3143_v39 = vunpack.i.h.bf16 %v3141_v25 }
  0xf7   : > { %v2261_v33 = vsel %vm2260_vm7, %v3137_v29, %v3138_v28  ;;  %v2262_v35 = vsel %vm2260_vm7, %v3138_v28, %v3142_v27  ;;  %2863 = vmatmul.msk.f32.vlgmr.msra.gmra.mxu0 %vm148_vm0, %v2860_v10  ;;  %v2263_v47 = vsel %vm2260_vm7, %v3142_v27, %v3143_v39  ;;  %v3176_v55 = vpop.permute.xlu2 %3175  ;;  %v3579_v28 = vld [vmem:[%s3696_s1 + $0xd0] sm:$0xff] }
  0xf8   : > { %2285 = vmatpush.msra.mxu2 %v2261_v33  ;;  %2208 = vmatpush.msra.mxu0 %v2165_v32  ;;  %v3178_v60 = vunpack.i.h.bf16 %v3176_v55  ;;  %v3177_v61 = vunpack.i.l.bf16 %v3176_v55 }
  0xf9   : > { %2867 = vmatmul.msk.f32.vlgmr.msra.gmra.mxu3 %vm148_vm0, %v2864_v22  ;;  %2865 = vmatmul.msk.f32.vlgmr.msra.gmra.mxu1 %vm148_vm0, %v2864_v22  ;;  %v3570_v22 = vld [vmem:[%s3696_s1 + $0xc8] sm:$0xff] }
  0xfa   : > { %2228 = vmatpush.msra.mxu1 %v2166_v34  ;;  %2305 = vmatpush.msra.mxu3 %v2262_v35  ;;  %v2649_v3 = vsel %vm2648_vm11, %v3177_v61, %v3178_v60 }
  0xfb   : > { %2871 = vmatmul.msk.f32.vlgmr.msrb.gmra.mxu2 %vm148_vm0, %v2868_v36 }
  0xfc   : > { %v3151_v40 = vpop.permute.xlu0 %3150  ;;  %2402 = vmatpush.msrb.mxu2 %v2359_v38 }
  0xfd   : > { %v3153_v41 = vunpack.i.h.bf16 %v3151_v40  ;;  %v3152_v42 = vunpack.i.l.bf16 %v3151_v40  ;;  %v3156_v43 = vpop.permute.xlu1 %3155 }
  0xfe   : > { %v3158_v45 = vunpack.i.h.bf16 %v3156_v43  ;;  %v3157_v46 = vunpack.i.l.bf16 %v3156_v43 }
  0xff   : > { %v2358_v48 = vsel %vm2357_vm8, %v3153_v41, %v3147_v31  ;;  %v2360_v49 = vsel %vm2357_vm8, %v3148_v30, %v3152_v42  ;;  %2869 = vmatmul.msk.f32.vlgmr.msrb.gmra.mxu0 %vm148_vm0, %v2868_v36 }
 0x100   : > { %2325 = vmatpush.msrb.mxu0 %v2263_v47  ;;  %v2457_v51 = vsel %vm2454_vm9, %v3157_v46, %v3158_v45  ;;  %v2456_v63 = vsel %vm2454_vm9, %v3163_v53, %v3157_v46 }
 0x101   : > { %2873 = vmatmul.msk.f32.vlgmr.msrb.gmra.mxu3 %vm148_vm0, %v2872_v44  ;;  %2870 = vmatmul.msk.f32.vlgmr.msrb.gmra.mxu1 %vm148_vm0, %v2868_v36 }
 0x102   : > { %2382 = vmatpush.msrb.mxu1 %v2358_v48  ;;  %2422 = vmatpush.msrb.mxu3 %v2360_v49 }
 0x103   : > { %2877 = vmatmul.msk.f32.vlgmr.msra.gmra.mxu2 %vm148_vm0, %v2876_v50 }
 0x104   : > { %2519 = vmatpush.msra.mxu2 %v2457_v51 }
 0x105   : > { %v3166_v57 = vpop.permute.xlu0 %3165  ;;  %v3538_v0 = vpop.permute.xlu1 %3170 }
 0x106   : > { %v3168_v58 = vunpack.i.h.bf16 %v3166_v57  ;;  %v3167_v59 = vunpack.i.l.bf16 %v3166_v57  ;;  %v3172_v4 = vunpack.i.l.bf16 %v3538_v0 }
 0x107   : > { %2874 = vmatmul.msk.f32.vlgmr.msra.gmra.mxu0 %vm148_vm0, %v2872_v44 }
 0x108   : > { %v2552_v1 = vsel %vm2551_vm10, %v3167_v59, %v3168_v58  ;;  %2479 = vmatpush.msra.mxu0 %v2455_v62  ;;  %v2553_v15 = vsel %vm2551_vm10, %v3168_v58, %v3172_v4 }
 0x109   : > { %2878 = vmatmul.msk.f32.vlgmr.msra.gmra.mxu3 %vm148_vm0, %v2876_v50  ;;  %2875 = vmatmul.msk.f32.vlgmr.msra.gmra.mxu1 %vm148_vm0, %v2872_v44 }
 0x10a   : > { %2499 = vmatpush.msra.mxu1 %v2456_v63  ;;  %2576 = vmatpush.msra.mxu3 %v2552_v1 }
 0x10b   : > { %2882 = vmatmul.msk.f32.vlgmr.msrb.gmra.mxu2 %vm148_vm0, %v2880_v2 }
 0x10c   : > { %v256_v5 = vpop.f32.mrf.mxu3  ;;  %v276_v8 = vpop.f32.mrf.mxu0  ;;  %2673 = vmatpush.msrb.mxu2 %v2649_v3 }
 0x10d   : > { %v302_v7 = vadd.f32 %v256_v5, %v169_v52  ;;  %v348_v9 = vpop.f32.mrf.mxu2  ;;  %v303_v10 = vadd.f32 %v276_v8, %v189_v56  ;;  %v3551_v12 = vpop.permute.xlu0 %2644 }
 0x10e   : > { %v296_v11 = vpop.f32.mrf.mxu1  ;;  %v2650_v16 = vsel %vm2648_vm11, %v3178_v60, %v3551_v12 }
 0x10f   : > { %v304_v13 = vadd.f32 %v301_v6, %v296_v11  ;;  %v394_v14 = vadd.f32 %v348_v9, %v302_v7  ;;  %2879 = vmatmul.msk.f32.vlgmr.msrb.gmra.mxu0 %vm148_vm0, %v2876_v50 }
 0x110   : > { %2596 = vmatpush.msrb.mxu0 %v2553_v15 }
 0x111   : > { %307 = vst.msk [vmem:[%s3474_s25 + $0x10] sm:$0xff] %vm214_vm3, %v304_v13  ;;  %2883 = vmatmul.msk.f32.vlgmr.msrb.gmra.mxu3 %vm148_vm0, %v2880_v2  ;;  %2881 = vmatmul.msk.f32.vlgmr.msrb.gmra.mxu1 %vm148_vm0, %v2880_v2 }
 0x112   : > { %2693 = vmatpush.msrb.mxu3 %v2650_v16 }
 0x113   : > { %2887 = vmatmul.msk.f32.vlgmr.msra.gmra.mxu2 %vm148_vm0, %v2884_v17 }
 0x114   : > { %v368_v18 = vpop.f32.mrf.mxu3  ;;  %v388_v20 = vpop.f32.mrf.mxu0 }
 0x115   : > { %v395_v19 = vadd.f32 %v368_v18, %v303_v10  ;;  %v465_v21 = vpop.f32.mrf.mxu2 }
 0x116   : > { %v445_v23 = vpop.f32.mrf.mxu1 }
 0x117   : > { %v492_v24 = vadd.f32 %v465_v21, %v395_v19  ;;  %v491_v26 = vadd.f32 %v445_v23, %v394_v14  ;;  %2885 = vmatmul.msk.f32.vlgmr.msra.gmra.mxu0 %vm148_vm0, %v2884_v17  ;;  %v3173_v21 = vunpack.i.h.bf16 %v3538_v0 }
 0x118   : > { %v393_v25 = vld [vmem:[%s3474_s25 + $0x10] sm:$0xff] }
 0x119   : > { %v396_v27 = vadd.f32 %v393_v25, %v388_v20  ;;  %2889 = vmatmul.msk.f32.vlgmr.msra.gmra.mxu3 %vm148_vm0, %v3570_v22  ;;  %2886 = vmatmul.msk.f32.vlgmr.msra.gmra.mxu1 %vm148_vm0, %v2884_v17 }
 0x11b   : > { %399 = vst.msk [vmem:[%s3474_s25 + $0x10] sm:$0xff] %vm214_vm3, %v396_v27  ;;  %2893 = vmatmul.msk.f32.vlgmr.msrb.gmra.mxu2 %vm148_vm0, %v3579_v28  ;;  %v2647_v27 = vpop.permute.xlu1 %2646 }
 0x11c   : > { %v485_v29 = vpop.f32.mrf.mxu3  ;;  %v542_v30 = vpop.f32.mrf.mxu0 }
 0x11d   : > { %v582_v31 = vpop.f32.mrf.mxu2  ;;  %v588_v32 = vadd.f32 %v542_v30, %v491_v26  ;;  %v2554_v26 = vsel %vm2551_vm10, %v3172_v4, %v3173_v21 }
 0x11e   : > { %v562_v33 = vpop.f32.mrf.mxu1  ;;  %2616 = vmatpush.msrb.mxu1 %v2554_v26 }
 0x11f   : > { %v589_v34 = vadd.f32 %v562_v33, %v492_v24  ;;  %2890 = vmatmul.msk.f32.vlgmr.msrb.gmra.mxu0 %vm148_vm0, %v3570_v22 }
 0x121   : > { %2894 = vmatmul.msk.f32.vlgmr.msrb.gmra.mxu3 %vm148_vm0, %v3579_v28  ;;  %2891 = vmatmul.msk.f32.vlgmr.msrb.gmra.mxu1 %vm148_vm0, %v3570_v22 }
 0x122   : > { %v490_v35 = vld [vmem:[%s3474_s25 + $0x10] sm:$0xff] }
 0x123   : > { %v493_v36 = vadd.f32 %v490_v35, %v485_v29  ;;  %v2651_v29 = vsel %vm2648_vm11, %v3551_v12, %v2647_v27 }
 0x124   : > { %v639_v37 = vpop.f32.mrf.mxu3  ;;  %v659_v39 = vpop.f32.mrf.mxu0  ;;  %2713 = vmatpush.msra.mxu0 %v2651_v29 }
 0x125   : > { %496 = vst.msk [vmem:[%s3474_s25 + $0x10] sm:$0xff] %vm214_vm3, %v493_v36  ;;  %v685_v38 = vadd.f32 %v639_v37, %v588_v32  ;;  %v686_v40 = vadd.f32 %v659_v39, %v589_v34 }
 0x126   : > { %v679_v41 = vpop.f32.mrf.mxu1  ;;  %v736_v42 = vpop.f32.mrf.mxu2 }
 0x127   : > { %v782_v43 = vadd.f32 %v736_v42, %v685_v38  ;;  %2895 = vmatmul.msk.f32.vlgmr.msra.gmra.mxu0 %vm148_vm0, %v3579_v28 }
 0x12c   : > { %v587_v44 = vld [vmem:[%s3474_s25 + $0x10] sm:$0xff]  ;;  %v756_v45 = vpop.f32.mrf.mxu3  ;;  %v776_v48 = vpop.f32.mrf.mxu0 }
 0x12d   : > { %v590_v46 = vadd.f32 %v587_v44, %v582_v31  ;;  %v783_v47 = vadd.f32 %v756_v45, %v686_v40 }
 0x12e   : > { %v833_v49 = vpop.f32.mrf.mxu1  ;;  %v853_v50 = vpop.f32.mrf.mxu2 }
 0x12f   : > { %593 = vst.msk [vmem:[%s3474_s25 + $0x10] sm:$0xff] %vm214_vm3, %v590_v46  ;;  %v879_v51 = vadd.f32 %v833_v49, %v782_v43  ;;  %v880_v52 = vadd.f32 %v853_v50, %v783_v47 }
 0x134   : > { %v873_v53 = vpop.f32.mrf.mxu3  ;;  %v930_v55 = vpop.f32.mrf.mxu0 }
 0x135   : > { %v976_v57 = vadd.f32 %v930_v55, %v879_v51 }
 0x136   : > { %v684_v54 = vld [vmem:[%s3474_s25 + $0x10] sm:$0xff]  ;;  %v950_v58 = vpop.f32.mrf.mxu1  ;;  %v970_v59 = vpop.f32.mrf.mxu2 }
 0x137   : > { %v687_v56 = vadd.f32 %v684_v54, %v679_v41  ;;  %v977_v60 = vadd.f32 %v950_v58, %v880_v52 }
 0x139   : > { %690 = vst.msk [vmem:[%s3474_s25 + $0x10] sm:$0xff] %vm214_vm3, %v687_v56 }
 0x13c   : > { %v1027_v61 = vpop.f32.mrf.mxu3  ;;  %v1047_v63 = vpop.f32.mrf.mxu0 }
 0x13d   : > { %v1073_v62 = vadd.f32 %v1027_v61, %v976_v57  ;;  %v1074_v1 = vadd.f32 %v1047_v63, %v977_v60 }
 0x13e   : > { %v1067_v2 = vpop.f32.mrf.mxu1  ;;  %v1124_v3 = vpop.f32.mrf.mxu2 }
 0x13f   : > { %v1170_v6 = vadd.f32 %v1124_v3, %v1073_v62 }
 0x140   : > { %v781_v5 = vld [vmem:[%s3474_s25 + $0x10] sm:$0xff] }
 0x141   : > { %v784_v7 = vadd.f32 %v781_v5, %v776_v48 }
 0x143   : > { %787 = vst.msk [vmem:[%s3474_s25 + $0x10] sm:$0xff] %vm214_vm3, %v784_v7 }
 0x144   : > { %v1144_v8 = vpop.f32.mrf.mxu3  ;;  %v1164_v10 = vpop.f32.mrf.mxu0 }
 0x145   : > { %v1171_v9 = vadd.f32 %v1144_v8, %v1074_v1 }
 0x146   : > { %v1221_v11 = vpop.f32.mrf.mxu1  ;;  %v1241_v13 = vpop.f32.mrf.mxu2 }
 0x147   : > { %v1268_v14 = vadd.f32 %v1241_v13, %v1171_v9  ;;  %v1267_v50 = vadd.f32 %v1221_v11, %v1170_v6 }
 0x14a   : > { %v878_v15 = vld [vmem:[%s3474_s25 + $0x10] sm:$0xff] }
 0x14b   : > { %v881_v16 = vadd.f32 %v878_v15, %v873_v53 }
 0x14c   : > { %v1261_v17 = vpop.f32.mrf.mxu3  ;;  %v1318_v18 = vpop.f32.mrf.mxu0 }
 0x14d   : > { %884 = vst.msk [vmem:[%s3474_s25 + $0x10] sm:$0xff] %vm214_vm3, %v881_v16  ;;  %v1364_v53 = vadd.f32 %v1318_v18, %v1267_v50 }
 0x14e   : > { %v1338_v19 = vpop.f32.mrf.mxu1  ;;  %v1358_v20 = vpop.f32.mrf.mxu2 }
 0x154   : > { %v975_v23 = vld [vmem:[%s3474_s25 + $0x10] sm:$0xff]  ;;  %v1415_v24 = vpop.f32.mrf.mxu3  ;;  %v1435_v30 = vpop.f32.mrf.mxu0 }
 0x155   : > { %v978_v25 = vadd.f32 %v975_v23, %v970_v59  ;;  %v1461_v56 = vadd.f32 %v1415_v24, %v1364_v53  ;;  %v1365_v59 = vadd.f32 %v1338_v19, %v1268_v14 }
 0x156   : > { %v1455_v31 = vpop.f32.mrf.mxu1  ;;  %v1512_v32 = vpop.f32.mrf.mxu2 }
 0x157   : > { %981 = vst.msk [vmem:[%s3474_s25 + $0x10] sm:$0xff] %vm214_vm3, %v978_v25  ;;  %v1558_v60 = vadd.f32 %v1512_v32, %v1461_v56  ;;  %v1462_v62 = vadd.f32 %v1435_v30, %v1365_v59 }
 0x15c   : > { %v1532_v0 = vpop.f32.mrf.mxu3  ;;  %v1552_v33 = vpop.f32.mrf.mxu0 }
 0x15d   : > { %v1559_v5 = vadd.f32 %v1532_v0, %v1462_v62 }
 0x15e   : > { %v1072_v4 = vld [vmem:[%s3474_s25 + $0x10] sm:$0xff]  ;;  %v1608_v12 = vpop.f32.mrf.mxu1  ;;  %v1628_v35 = vpop.f32.mrf.mxu2 }
 0x15f   : > { %v1075_v34 = vadd.f32 %v1072_v4, %v1067_v2  ;;  %v1654_v63 = vadd.f32 %v1608_v12, %v1558_v60 }
 0x161   : > { %1078 = vst.msk [vmem:[%s3474_s25 + $0x10] sm:$0xff] %vm214_vm3, %v1075_v34 }
 0x164   : > { %v3621_v36 = vpop.f32.mrf.mxu3  ;;  %v1705_v37 = vpop.f32.mrf.mxu0 }
 0x165   : > { %v1751_v6 = vadd.f32 %v1705_v37, %v1654_v63 }
 0x166   : > { %v1725_v22 = vpop.f32.mrf.mxu1  ;;  %v3623_v38 = vpop.f32.mrf.mxu2 }
 0x168   : > { %v1169_v39 = vld [vmem:[%s3474_s25 + $0x10] sm:$0xff] }
 0x169   : > { %v1172_v40 = vadd.f32 %v1169_v39, %v1164_v10  ;;  %v1655_v10 = vadd.f32 %v1628_v35, %v1559_v5 }
 0x16b   : > { %1175 = vst.msk [vmem:[%s3474_s25 + $0x10] sm:$0xff] %vm214_vm3, %v1172_v40  ;;  %v1752_v13 = vadd.f32 %v1725_v22, %v1655_v10 }
 0x16c   : > { %v1802_v28 = vpop.f32.mrf.mxu3  ;;  %v1822_v41 = vpop.f32.mrf.mxu0 }
 0x16d   : > { %v1848_v8 = vadd.f32 %v1802_v28, %v1751_v6  ;;  %v1849_v16 = vadd.f32 %v1822_v41, %v1752_v13 }
 0x16e   : > { %v3628_v42 = vpop.f32.mrf.mxu1  ;;  %v1899_v43 = vpop.f32.mrf.mxu2 }
 0x16f   : > { %v1945_v14 = vadd.f32 %v1899_v43, %v1848_v8 }
 0x172   : > { %v1266_v44 = vld [vmem:[%s3474_s25 + $0x10] sm:$0xff] }
 0x173   : > { %v1269_v45 = vadd.f32 %v1266_v44, %v1261_v17 }
 0x174   : > { %v1919_v46 = vpop.f32.mrf.mxu3  ;;  %v3633_v47 = vpop.f32.mrf.mxu0 }
 0x175   : > { %1272 = vst.msk [vmem:[%s3474_s25 + $0x10] sm:$0xff] %vm214_vm3, %v1269_v45  ;;  %v1946_v21 = vadd.f32 %v1919_v46, %v1849_v16 }
 0x176   : > { %v1996_v48 = vpop.f32.mrf.mxu1  ;;  %v2016_v49 = vpop.f32.mrf.mxu2 }
 0x177   : > { %v2042_v17 = vadd.f32 %v1996_v48, %v1945_v14  ;;  %v2043_v27 = vadd.f32 %v2016_v49, %v1946_v21 }
 0x17c   : > { %v1363_v51 = vld [vmem:[%s3474_s25 + $0x10] sm:$0xff]  ;;  %v3636_v52 = vpop.f32.mrf.mxu3  ;;  %v2093_v55 = vpop.f32.mrf.mxu0 }
 0x17d   : > { %v1366_v54 = vadd.f32 %v1363_v51, %v1358_v20  ;;  %v2139_v23 = vadd.f32 %v2093_v55, %v2042_v17 }
 0x17e   : > { %v3640_v57 = vpop.f32.mrf.mxu2  ;;  %v2113_v58 = vpop.f32.mrf.mxu1 }
 0x17f   : > { %1369 = vst.msk [vmem:[%s3474_s25 + $0x10] sm:$0xff] %vm214_vm3, %v1366_v54  ;;  %v2140_v30 = vadd.f32 %v2113_v58, %v2043_v27 }
 0x184   : > { %v2190_v61 = vpop.f32.mrf.mxu3  ;;  %v2210_v2 = vpop.f32.mrf.mxu0 }
 0x185   : > { %v2236_v24 = vadd.f32 %v2190_v61, %v2139_v23  ;;  %v2237_v0 = vadd.f32 %v2210_v2, %v2140_v30 }
 0x186   : > { %v1460_v1 = vld [vmem:[%s3474_s25 + $0x10] sm:$0xff]  ;;  %v2287_v7 = vpop.f32.mrf.mxu2  ;;  %v2230_v9 = vpop.f32.mrf.mxu1 }
 0x187   : > { %v1463_v3 = vadd.f32 %v1460_v1, %v1455_v31  ;;  %v2333_v31 = vadd.f32 %v2287_v7, %v2236_v24 }
 0x189   : > { %1466 = vst.msk [vmem:[%s3474_s25 + $0x10] sm:$0xff] %vm214_vm3, %v1463_v3 }
 0x18c   : > { %v2307_v11 = vpop.f32.mrf.mxu3  ;;  %v2327_v15 = vpop.f32.mrf.mxu0 }
 0x18d   : > { %v2334_v12 = vadd.f32 %v2307_v11, %v2237_v0 }
 0x18e   : > { %v2404_v18 = vpop.f32.mrf.mxu2  ;;  %v2384_v25 = vpop.f32.mrf.mxu1 }
 0x18f   : > { %v2430_v4 = vadd.f32 %v2384_v25, %v2333_v31  ;;  %v2431_v40 = vadd.f32 %v2404_v18, %v2334_v12 }
 0x190   : > { %v1557_v19 = vld [vmem:[%s3474_s25 + $0x10] sm:$0xff] }
 0x191   : > { %v1560_v20 = vadd.f32 %v1557_v19, %v1552_v33 }
 0x193   : > { %1563 = vst.msk [vmem:[%s3474_s25 + $0x10] sm:$0xff] %vm214_vm3, %v1560_v20 }
 0x194   : > { %v2424_v26 = vpop.f32.mrf.mxu3  ;;  %v2481_v29 = vpop.f32.mrf.mxu0 }
 0x195   : > { %v2527_v35 = vadd.f32 %v2481_v29, %v2430_v4 }
 0x196   : > { %v2521_v32 = vpop.f32.mrf.mxu2  ;;  %v2501_v39 = vpop.f32.mrf.mxu1 }
 0x197   : > { %v2528_v44 = vadd.f32 %v2501_v39, %v2431_v40 }
 0x19a   : > { %v1653_v34 = vld [vmem:[%s3474_s25 + $0x10] sm:$0xff] }
 0x19b   : > { %v1656_v33 = vadd.f32 %v1653_v34, %v3621_v36 }
 0x19c   : > { %v2578_v37 = vpop.f32.mrf.mxu3  ;;  %v2598_v41 = vpop.f32.mrf.mxu0 }
 0x19d   : > { %1659 = vst.msk [vmem:[%s3474_s25 + $0x10] sm:$0xff] %vm214_vm3, %v1656_v33  ;;  %v2624_v22 = vadd.f32 %v2578_v37, %v2527_v35  ;;  %v2625_v36 = vadd.f32 %v2598_v41, %v2528_v44 }
 0x19e   : > { %v2675_v28 = vpop.f32.mrf.mxu2 }
 0x19f   : > { %v2721_v43 = vadd.f32 %v2675_v28, %v2624_v22 }
 0x1a1   : > { %2724 = vst [vmem:[%s3474_s25] sm:$0xff] %v2721_v43 }
 0x1a4   : > { %v1750_v45 = vld [vmem:[%s3474_s25 + $0x10] sm:$0xff]  ;;  %v2695_v46 = vpop.f32.mrf.mxu3  ;;  %v2715_v3 = vpop.f32.mrf.mxu0 }
 0x1a5   : > { %v1753_v48 = vadd.f32 %v1750_v45, %v3623_v38  ;;  %v2722_v49 = vadd.f32 %v2695_v46, %v2625_v36 }
 0x1a7   : > { %1756 = vst.msk [vmem:[%s3474_s25 + $0x10] sm:$0xff] %vm214_vm3, %v1753_v48 }
 0x1a8   : > { %2725 = vst [vmem:[%s3474_s25 + $0x8] sm:$0xff] %v2722_v49 }
 0x1ae   : > { %v1847_v50 = vld [vmem:[%s3474_s25 + $0x10] sm:$0xff] }
 0x1af   : > { %v1850_v51 = vadd.f32 %v1847_v50, %v3628_v42 }
 0x1b1   : > { %1853 = vst.msk [vmem:[%s3474_s25 + $0x10] sm:$0xff] %vm214_vm3, %v1850_v51 }
 0x1b8   : > { %v1944_v53 = vld [vmem:[%s3474_s25 + $0x10] sm:$0xff] }
 0x1b9   : > { %v1947_v54 = vadd.f32 %v1944_v53, %v3633_v47 }
 0x1bb   : > { %1950 = vst.msk [vmem:[%s3474_s25 + $0x10] sm:$0xff] %vm214_vm3, %v1947_v54 }
 0x1c2   : > { %v2041_v38 = vld [vmem:[%s3474_s25 + $0x10] sm:$0xff] }
 0x1c3   : > { %v2044_v55 = vadd.f32 %v2041_v38, %v3636_v52 }
 0x1c5   : > { %2047 = vst.msk [vmem:[%s3474_s25 + $0x10] sm:$0xff] %vm214_vm3, %v2044_v55 }
 0x1cc   : > { %v2138_v56 = vld [vmem:[%s3474_s25 + $0x10] sm:$0xff] }
 0x1cd   : > { %v2141_v42 = vadd.f32 %v2138_v56, %v3640_v57  ;;  %v2618_v57 = vpop.f32.mrf.mxu1 }
 0x1cf   : > { %2144 = vst.msk [vmem:[%s3474_s25 + $0x10] sm:$0xff] %vm214_vm3, %v2141_v42 }
 0x1d6   : > { %v2235_v58 = vld [vmem:[%s3474_s25 + $0x10] sm:$0xff] }
 0x1d7   : > { %v2238_v59 = vadd.f32 %v2235_v58, %v2230_v9 }
 0x1d9   : > { %2241 = vst.msk [vmem:[%s3474_s25 + $0x10] sm:$0xff] %vm214_vm3, %v2238_v59 }
 0x1e0   : > { %v2332_v47 = vld [vmem:[%s3474_s25 + $0x10] sm:$0xff] }
 0x1e1   : > { %v2335_v60 = vadd.f32 %v2332_v47, %v2327_v15 }
 0x1e3   : > { %2338 = vst.msk [vmem:[%s3474_s25 + $0x10] sm:$0xff] %vm214_vm3, %v2335_v60 }
 0x1ea   : > { %v2429_v52 = vld [vmem:[%s3474_s25 + $0x10] sm:$0xff] }
 0x1eb   : > { %v2432_v61 = vadd.f32 %v2429_v52, %v2424_v26 }
 0x1ed   : > { %2435 = vst.msk [vmem:[%s3474_s25 + $0x10] sm:$0xff] %vm214_vm3, %v2432_v61 }
 0x1f4   : > { %v2526_v62 = vld [vmem:[%s3474_s25 + $0x10] sm:$0xff] }
 0x1f5   : > { %v2529_v63 = vadd.f32 %v2526_v62, %v2521_v32 }
 0x1f7   : > { %2532 = vst.msk [vmem:[%s3474_s25 + $0x10] sm:$0xff] %vm214_vm3, %v2529_v63 }
 0x1fe   : > { %v2623_v1 = vld [vmem:[%s3474_s25 + $0x10] sm:$0xff] }
 0x1ff   : > { %v2626_v2 = vadd.f32 %v2623_v1, %v2618_v57 }
 0x201   : > { %2629 = vst.msk [vmem:[%s3474_s25 + $0x10] sm:$0xff] %vm214_vm3, %v2626_v2 }
 0x208   : > { %v2720_v5 = vld [vmem:[%s3474_s25 + $0x10] sm:$0xff] }
 0x209   : > { %v2723_v6 = vadd.f32 %v2720_v5, %v2715_v3 }
 0x20b   : > { %2726 = vst.msk [vmem:[%s3474_s25 + $0x10] sm:$0xff] %vm214_vm3, %v2723_v6 }
 0x20c PF: > { %s12_s9 = sadd.s32 1, %s3185_s9  }
 0x20d   : > { %p9_p4 = scmp.ge.s32.totalorder %s12_s9, 4  }
 0x20f   :  { %11 = sbr.rel (!%p9_p4) target bundleno = 1 (0x1), region = 84 }

</bundles_post_ra>
